<compile_context>
chip_gen: v6e
topology: v6e:2x2x1
jax: 0.10.0
libtpu: 0.0.40
codegen_flags: <defaults>
</compile_context>

<pallas_src>
import numpy as np
import jax
import jax.numpy as jnp
from jax.experimental import pallas as pl
from jax.experimental.pallas import tpu as pltpu

_LANE = 128      # feature padding target
_SUBLANE = 8     # recipe-batch alignment
_BB_CAP = 64     # max recipes per grid shard (keeps grid >= 2 for large batches -> both TCs on v7x)


def _rup(n, m):
    return ((n + m - 1) // m) * m


# ------------------------------ fused kernel -------------------------------

def _fused_csi_kernel(x_ref, pe_ref, len_ref,
                      w_comb_ref, b_comb_ref, w_hh_ref,
                      proj_w_ref, proj_b_ref,
                      out_ref, mean_ref,
                      h_sc, c_sc, gates_sc, hall_sc):
    """One batch shard of BB recipes: (folded AEN+W_ih) -> LSTM -> proj -> masked mean."""
    T, BB, Dip = x_ref.shape
    G = w_comb_ref.shape[1]        # 4*H padded (as one contiguous slab) to a 128 multiple
    H = w_hh_ref.shape[0]          # true hidden size (no per-gate padding)
    Pp = proj_w_ref.shape[1]

    # ---- hoisted input projection (AEN folded): gates_x = x @ W_comb + b + pe_proj[t] ----
    # TODO(synk): the real attention_embedding_network is config-driven
    # (build_position_embedding(AEN)); modeled as linear projection + learned
    # within-recipe position embedding, both folded into W_ih here.
    xf = x_ref[...].reshape(T * BB, Dip)                           # bf16
    gx = jnp.dot(xf, w_comb_ref[...], preferred_element_type=jnp.float32)
    gates_sc[...] = (gx.reshape(T, BB, G)
                     + pe_ref[...][:, None, :]
                     + b_comb_ref[...])

    h_sc[...] = jnp.zeros_like(h_sc)
    c_sc[...] = jnp.zeros_like(c_sc)

    # ---- sequential recurrence: only (BB,H)@(H,4H) + gate math on the serial path ----
    def step(t, carry):
        g = gates_sc[t] + jnp.dot(h_sc[...].astype(jnp.bfloat16), w_hh_ref[...],
                                  preferred_element_type=jnp.float32)
        # PyTorch nn.LSTM gate order: i, f, g, o (contiguous width-H slices, no padding).
        i = jax.nn.sigmoid(g[:, 0 * H:1 * H])
        f = jax.nn.sigmoid(g[:, 1 * H:2 * H])
        gg = jnp.tanh(g[:, 2 * H:3 * H])
        o = jax.nn.sigmoid(g[:, 3 * H:4 * H])
        c = f * c_sc[...] + i * gg
        h = o * jnp.tanh(c)
        c_sc[...] = c
        h_sc[...] = h
        hall_sc[t] = h
        return carry

    jax.lax.fori_loop(0, T, step, 0, unroll=min(T, 8))

    # ---- output projection off the serial path, lane-dense store ----
    proj = (jnp.dot(hall_sc[...].reshape(T * BB, H).astype(jnp.bfloat16),
                    proj_w_ref[...], preferred_element_type=jnp.float32)
            + proj_b_ref[...]).reshape(T, BB, Pp)
    out_ref[...] = proj.astype(out_ref.dtype)

    # ---- per-recipe mean over valid timesteps (mask built in-kernel) ----
    lens = len_ref[...]                                             # (BB, 1) f32
    t_iota = jax.lax.broadcasted_iota(jnp.int32, (T, BB, 1), 0).astype(jnp.float32)
    mask = (t_iota < lens[None, :, :]).astype(jnp.float32)          # (T, BB, 1)
    inv_len = pl.reciprocal(lens, approx=True)                      # (BB, 1)
    mean_ref[...] = (jnp.sum(proj * mask, axis=0) * inv_len).astype(mean_ref.dtype)


def _run_fused(x_pad, pe_proj, len_f, pparams, T, B_pad, BB, Dip, G, H, Pp):
    grid = (B_pad // BB,)

    # VMEM budget: double-buffered blocks + persistent scratch, doubled for margin.
    def _sz(shape, itemsize):
        return int(np.prod(shape)) * itemsize
    blk = (2 * _sz((T, BB, Dip), 2) + 2 * _sz((T, G), 4) + 2 * _sz((BB, 1), 4)
           + 2 * _sz((Dip, G), 2) + 2 * _sz((1, G), 4) + 2 * _sz((H, G), 2)
           + 2 * _sz((H, Pp), 2) + 2 * _sz((1, Pp), 4)
           + 2 * _sz((T, BB, Pp), 4) + 2 * _sz((BB, Pp), 4)
           + 2 * _sz((BB, H), 4) + _sz((T, BB, G), 4) + _sz((T, BB, H), 4))
    vmem_limit = int(min(max(2 * blk + (4 << 20), 32 << 20), 64 << 20))
    # TODO(synk): for very large T*BB on v7x (64 MiB VMEM) chunk gates_sc over T
    # instead of materializing the full (T, BB, 4H) buffer.

    return pl.pallas_call(
        _fused_csi_kernel,
        out_shape=(jax.ShapeDtypeStruct((T, B_pad, Pp), jnp.float32),
                   jax.ShapeDtypeStruct((B_pad, Pp), jnp.float32)),
        grid_spec=pltpu.PrefetchScalarGridSpec(
            num_scalar_prefetch=0,
            grid=grid,
            in_specs=[
                pl.BlockSpec((T, BB, Dip), lambda b: (0, b, 0)),   # x (time-major, bf16)
                pl.BlockSpec((T, G), lambda b: (0, 0)),            # pos-embed @ W_ih (f32)
                pl.BlockSpec((BB, 1), lambda b: (b, 0)),           # per-recipe lengths (f32)
                pl.BlockSpec((Dip, G), lambda b: (0, 0)),          # W_comb = aen_w @ W_ih (bf16)
                pl.BlockSpec((1, G), lambda b: (0, 0)),            # b_comb (f32)
                pl.BlockSpec((H, G), lambda b: (0, 0)),            # lstm W_hh (bf16)
                pl.BlockSpec((H, Pp), lambda b: (0, 0)),           # proj_w (bf16)
                pl.BlockSpec((1, Pp), lambda b: (0, 0)),           # proj_b (f32)
            ],
            out_specs=[
                pl.BlockSpec((T, BB, Pp), lambda b: (0, b, 0)),    # projected features
                pl.BlockSpec((BB, Pp), lambda b: (b, 0)),          # per-recipe mean
            ],
            scratch_shapes=[
                pltpu.VMEM((BB, H), jnp.float32),          # h state
                pltpu.VMEM((BB, H), jnp.float32),          # c state
                pltpu.VMEM((T, BB, G), jnp.float32),       # hoisted input gates
                pltpu.VMEM((T, BB, H), jnp.float32),       # all hidden states
            ],
        ),
        compiler_params=pltpu.CompilerParams(
            dimension_semantics=("parallel",),   # batch shards across TCs on v7x
            vmem_limit_bytes=vmem_limit,
        ),
        # note: weight specs have constant index_maps; single-buffering them
        # (pipeline_mode=pl.Buffered(1)) would save a little VMEM but is skipped
        # here to keep lowering maximally portable.
    )(x_pad, pe_proj, len_f,
      pparams["w_comb"], pparams["b_comb"], pparams["w_hh"],
      pparams["proj_w"], pparams["proj_b"])


# ------------------------------ module wrapper ------------------------------

def init_params(key, d_img, d_aen, h, p, max_len):
    """Deterministic synthetic parameter init (shapes follow the module's __init__)."""
    ks = jax.random.split(key, 7)
    s = 0.1
    return dict(
        # attention_embedding_network (AEN)
        aen_w=(jax.random.normal(ks[0], (d_img, d_aen), jnp.float32) * s),
        aen_b=jnp.zeros((1, d_aen), jnp.float32),
        aen_pos_embed=(jax.random.normal(ks[1], (max_len, d_aen), jnp.float32) * s),
        # csi_lstm (nn.LSTM: stored transposed; bias is the folded b_ih + b_hh)
        lstm_w_ih=(jax.random.normal(ks[2], (d_aen, 4 * h), jnp.float32) * s),
        lstm_w_hh=(jax.random.normal(ks[3], (h, 4 * h), jnp.float32) * s),
        lstm_b=(jax.random.normal(ks[4], (1, 4 * h), jnp.float32) * s),
        # csi_lstm_proj (nn.Linear)
        proj_w=(jax.random.normal(ks[5], (h, p), jnp.float32) * s),
        proj_b=(jax.random.normal(ks[6], (1, p), jnp.float32) * s),
    )


def csi_encoder_forward(img_feature, recipe_img_pos, params):
    lengths = [p1 - p0 for (p0, p1) in recipe_img_pos]
    R = len(lengths)
    T = max(lengths)

    # recipe tile: 8-sublane aligned, grows with the batch (cap keeps grid >= 2 on big batches)
    BB = min(_rup(max(R, 1), _SUBLANE), _BB_CAP)
    B_pad = _rup(max(R, 1), BB)

    D_img = img_feature.shape[1]
    H = params["lstm_w_hh"].shape[0]
    P = params["proj_w"].shape[1]
    Dip = _rup(D_img, _LANE)
    G = _rup(4 * H, _LANE)          # contiguous gate slab padded as a whole (NOT per-gate)
    Pp = _rup(P, _LANE)

    # ---- static (Python) index/length construction; one gather, one pad ----
    idx_np = np.zeros((T, B_pad), np.int32)
    len_np = np.ones((B_pad, 1), np.float32)   # padded recipes get len=1 (outputs never read)
    for b, (p0, p1) in enumerate(recipe_img_pos):
        l = p1 - p0
        idx_np[:l, b] = np.arange(p0, p1, dtype=np.int32)
        len_np[b, 0] = float(l)

    # Padded timesteps alias row 0 of img_feature; correct because per-recipe outputs
    # are truncated to the valid length and the mean is masked in-kernel.
    # TODO(synk): for heavily ragged batches, gather inside the kernel (scalar-prefetched
    # indices / manual DMA) to avoid DMAing the padding.
    x_tm = jnp.take(img_feature, jnp.asarray(idx_np), axis=0)            # (T, B_pad, D_img)
    x_pad = jnp.pad(x_tm, ((0, 0), (0, 0), (0, Dip - D_img))).astype(jnp.bfloat16)

    # ---- fold AEN linear + pos-embed + biases into the LSTM input projection ----
    w_ih = params["lstm_w_ih"]                                           # (D_aen, 4H)
    w_comb = params["aen_w"] @ w_ih                                      # (D_img, 4H)
    b_comb = params["aen_b"] @ w_ih + params["lstm_b"]                   # (1, 4H)
    pe_proj = params["aen_pos_embed"][:T] @ w_ih                         # (T, 4H)

    pad_g = G - 4 * H
    pparams = dict(
        w_comb=jnp.pad(w_comb, ((0, Dip - D_img), (0, pad_g))).astype(jnp.bfloat16),
        b_comb=jnp.pad(b_comb, ((0, 0), (0, pad_g))),
        w_hh=jnp.pad(params["lstm_w_hh"], ((0, 0), (0, pad_g))).astype(jnp.bfloat16),
        proj_w=jnp.pad(params["proj_w"], ((0, 0), (0, Pp - P))).astype(jnp.bfloat16),
        proj_b=jnp.pad(params["proj_b"], ((0, 0), (0, Pp - P))),
    )
    pe_pad = jnp.pad(pe_proj, ((0, 0), (0, pad_g)))

    h_out, mean_out = _run_fused(x_pad, pe_pad, jnp.asarray(len_np), pparams,
                                 T, B_pad, BB, Dip, G, H, Pp)

    # ---- encode_csi_temporal_info (is_shuffle=False path): per-recipe slices ----
    csi_feats = [h_out[:lengths[i], i, :P] for i in range(R)]
    csi_feat_mean = [mean_out[i, :P] for i in range(R)]
    # TODO(synk): is_shuffle=True branch (host-side random swap of timesteps) not
    # implemented; module default is_shuffle=False returns None for these keys.
    return {
        "csi_feature_mean": csi_feat_mean,
        "csi_features": csi_feats,
        "csi_shuffle_features_mean": None,
        "csi_shuffle_features_label": None,
    }


# ------------------------------ pure reference ------------------------------

def _reference_forward(img_feature, recipe_img_pos, params):
    """NumPy f32 reference mirroring the PyTorch module's math."""
    def sigmoid(z):
        return 1.0 / (1.0 + np.exp(-z))

    x = np.asarray(img_feature, np.float32)
    aen_w = np.asarray(params["aen_w"]); aen_b = np.asarray(params["aen_b"])
    pos_embed = np.asarray(params["aen_pos_embed"])
    w_ih = np.asarray(params["lstm_w_ih"]); w_hh = np.asarray(params["lstm_w_hh"])
    b = np.asarray(params["lstm_b"])[0]
    proj_w = np.asarray(params["proj_w"]); proj_b = np.asarray(params["proj_b"])
    H = w_hh.shape[0]

    lengths = [p1 - p0 for (p0, p1) in recipe_img_pos]
    pos_idx = np.concatenate([np.arange(l) for l in lengths])
    aen = x @ aen_w + aen_b + pos_embed[pos_idx]
    feats = [aen[p0:p1] for (p0, p1) in recipe_img_pos]

    outs = []
    for f in feats:
        h = np.zeros((H,), np.float32)
        c = np.zeros((H,), np.float32)
        hs = []
        for t in range(f.shape[0]):
            g = f[t] @ w_ih + h @ w_hh + b
            i = sigmoid(g[0:H]); ff = sigmoid(g[H:2 * H])
            gg = np.tanh(g[2 * H:3 * H]); o = sigmoid(g[3 * H:4 * H])
            c = ff * c + i * gg
            h = o * np.tanh(c)
            hs.append(h)
        outs.append(np.stack(hs))
    cat = np.concatenate(outs, 0)
    feature = cat @ proj_w + proj_b
    per = [feature[p0:p1] for (p0, p1) in recipe_img_pos]
    means = [p.mean(0) for p in per]
    return per, means


if __name__ == "__main__":
    key = jax.random.PRNGKey(0)
    N, D_IMG, D_AEN, H, P = 8, 32, 32, 32, 32
    recipe_img_pos = [(0, 3), (3, 8)]  # two recipes: 3 and 5 cooking-step images

    k_x, k_p = jax.random.split(key)
    img_feature = jax.random.normal(k_x, (N, D_IMG), jnp.float32)
    params = init_params(k_p, D_IMG, D_AEN, H, P, max_len=N)

    out = csi_encoder_forward(img_feature, recipe_img_pos, params)
    jax.block_until_ready(out["csi_features"])
    jax.block_until_ready(out["csi_feature_mean"])

    # contract: shapes match the module's output
    assert out["csi_features"][0].shape == (3, P)
    assert out["csi_features"][1].shape == (5, P)
    assert out["csi_feature_mean"][0].shape == (P,)
    assert out["csi_shuffle_features_mean"] is None

    # numerics: compare against pure NumPy reference (bf16 MXU operands, f32 accumulation)
    ref_feats, ref_means = _reference_forward(img_feature, recipe_img_pos, params)
    for i in range(len(recipe_img_pos)):
        np.testing.assert_allclose(np.asarray(out["csi_features"][i]), ref_feats[i],
                                   rtol=5e-2, atol=1e-2)
        np.testing.assert_allclose(np.asarray(out["csi_feature_mean"][i]), ref_means[i],
                                   rtol=5e-2, atol=1e-2)

    print("KERNEL_OK")
</pallas_src>

<mosaic_0001>
module attributes {stable_mosaic.version = 11 : i64} {
  func.func @_fused_csi_kernel(%arg0: i32, %arg1: memref<5x8x128xbf16, #tpu.memory_space<vmem>>, %arg2: memref<5x128xf32, #tpu.memory_space<vmem>>, %arg3: memref<8x1xf32, #tpu.memory_space<vmem>>, %arg4: memref<128x128xbf16, #tpu.memory_space<vmem>>, %arg5: memref<1x128xf32, #tpu.memory_space<vmem>>, %arg6: memref<32x128xbf16, #tpu.memory_space<vmem>>, %arg7: memref<32x128xbf16, #tpu.memory_space<vmem>>, %arg8: memref<1x128xf32, #tpu.memory_space<vmem>>, %arg9: memref<5x8x128xf32, #tpu.memory_space<vmem>>, %arg10: memref<8x128xf32, #tpu.memory_space<vmem>>, %arg11: memref<8x32xf32, #tpu.memory_space<vmem>>, %arg12: memref<8x32xf32, #tpu.memory_space<vmem>>, %arg13: memref<5x8x128xf32, #tpu.memory_space<vmem>>, %arg14: memref<5x8x32xf32, #tpu.memory_space<vmem>>) attributes {dimension_semantics = [#tpu.dimension_semantics<parallel>], iteration_bounds = array<i64: 1>, scalar_prefetch = 0 : i64, scratch_operands = 4 : i64, tpu.core_type = #tpu.core_type<tc>, window_params = [{transform_indices = @transform_0, window_bounds = array<i64: 5, 8, 128>}, {pipeline_mode = #tpu.pipeline_mode<synchronous>, transform_indices = @transform_1, window_bounds = array<i64: 5, 128>}, {transform_indices = @transform_2, window_bounds = array<i64: 8, 1>}, {pipeline_mode = #tpu.pipeline_mode<synchronous>, transform_indices = @transform_3, window_bounds = array<i64: 128, 128>}, {pipeline_mode = #tpu.pipeline_mode<synchronous>, transform_indices = @transform_4, window_bounds = array<i64: 1, 128>}, {pipeline_mode = #tpu.pipeline_mode<synchronous>, transform_indices = @transform_5, window_bounds = array<i64: 32, 128>}, {pipeline_mode = #tpu.pipeline_mode<synchronous>, transform_indices = @transform_6, window_bounds = array<i64: 32, 128>}, {pipeline_mode = #tpu.pipeline_mode<synchronous>, transform_indices = @transform_7, window_bounds = array<i64: 1, 128>}, {transform_indices = @transform_8, window_bounds = array<i64: 5, 8, 128>}, {transform_indices = @transform_9, window_bounds = array<i64: 8, 128>}]} {
    %c0 = arith.constant 0 : index
    %c0_0 = arith.constant 0 : index
    %c0_1 = arith.constant 0 : index
    %0 = vector.load %arg1[%c0, %c0_0, %c0_1] : memref<5x8x128xbf16, #tpu.memory_space<vmem>>, vector<5x8x128xbf16>
    %1 = vector.shape_cast %0 : vector<5x8x128xbf16> to vector<40x128xbf16>
    %c0_2 = arith.constant 0 : index
    %c0_3 = arith.constant 0 : index
    %2 = vector.load %arg4[%c0_2, %c0_3] : memref<128x128xbf16, #tpu.memory_space<vmem>>, vector<128x128xbf16>
    %cst = arith.constant dense<0.000000e+00> : vector<40x128xf32>
    %3 = tpu.matmul %1, %2, %cst {dimension_numbers = #tpu.dot_dimension_numbers<[1], [0], [0], [1], [0, 0, 1, 1], [], []>} : vector<40x128xbf16>, vector<128x128xbf16>, vector<40x128xf32> -> vector<40x128xf32>
    %4 = vector.shape_cast %3 : vector<40x128xf32> to vector<5x8x128xf32>
    %c0_4 = arith.constant 0 : index
    %c0_5 = arith.constant 0 : index
    %5 = vector.load %arg2[%c0_4, %c0_5] : memref<5x128xf32, #tpu.memory_space<vmem>>, vector<5x128xf32>
    %6 = vector.shape_cast %5 : vector<5x128xf32> to vector<5x1x128xf32>
    %7 = vector.broadcast %6 : vector<5x1x128xf32> to vector<5x8x128xf32>
    %8 = arith.addf %4, %7 : vector<5x8x128xf32>
    %c0_6 = arith.constant 0 : index
    %c0_7 = arith.constant 0 : index
    %9 = vector.load %arg5[%c0_6, %c0_7] : memref<1x128xf32, #tpu.memory_space<vmem>>, vector<1x128xf32>
    %10 = vector.shape_cast %9 : vector<1x128xf32> to vector<1x1x128xf32>
    %11 = vector.broadcast %10 : vector<1x1x128xf32> to vector<5x8x128xf32>
    %12 = arith.addf %8, %11 : vector<5x8x128xf32>
    %c0_8 = arith.constant 0 : index
    %c0_9 = arith.constant 0 : index
    %c0_10 = arith.constant 0 : index
    %13 = vector.load %arg13[%c0_8, %c0_9, %c0_10] : memref<5x8x128xf32, #tpu.memory_space<vmem>>, vector<5x8x128xf32>
    tpu.vector_store %arg13[%c0_8, %c0_9, %c0_10], %12 {strides = array<i32>} : memref<5x8x128xf32, #tpu.memory_space<vmem>>, vector<5x8x128xf32>,
    %cst_11 = arith.constant 0.000000e+00 : f32
    %14 = vector.broadcast %cst_11 : f32 to vector<8x32xf32>
    %c0_12 = arith.constant 0 : index
    %c0_13 = arith.constant 0 : index
    %15 = vector.load %arg11[%c0_12, %c0_13] : memref<8x32xf32, #tpu.memory_space<vmem>>, vector<8x32xf32>
    tpu.vector_store %arg11[%c0_12, %c0_13], %14 {strides = array<i32>} : memref<8x32xf32, #tpu.memory_space<vmem>>, vector<8x32xf32>,
    %cst_14 = arith.constant 0.000000e+00 : f32
    %16 = vector.broadcast %cst_14 : f32 to vector<8x32xf32>
    %c0_15 = arith.constant 0 : index
    %c0_16 = arith.constant 0 : index
    %17 = vector.load %arg12[%c0_15, %c0_16] : memref<8x32xf32, #tpu.memory_space<vmem>>, vector<8x32xf32>
    tpu.vector_store %arg12[%c0_15, %c0_16], %16 {strides = array<i32>} : memref<8x32xf32, #tpu.memory_space<vmem>>, vector<8x32xf32>,
    %c0_i32 = arith.constant 0 : i32
    %18 = arith.index_cast %c0_i32 : i32 to index
    %c0_17 = arith.constant 0 : index
    %c0_18 = arith.constant 0 : index
    %19 = vector.load %arg13[%18, %c0_17, %c0_18] : memref<5x8x128xf32, #tpu.memory_space<vmem>>, vector<1x8x128xf32>
    %20 = vector.shape_cast %19 : vector<1x8x128xf32> to vector<8x128xf32>
    %c0_19 = arith.constant 0 : index
    %c0_20 = arith.constant 0 : index
    %21 = vector.load %arg11[%c0_19, %c0_20] : memref<8x32xf32, #tpu.memory_space<vmem>>, vector<8x32xf32>
    %22 = arith.truncf %21 : vector<8x32xf32> to vector<8x32xbf16>
    %c0_21 = arith.constant 0 : index
    %c0_22 = arith.constant 0 : index
    %23 = vector.load %arg6[%c0_21, %c0_22] : memref<32x128xbf16, #tpu.memory_space<vmem>>, vector<32x128xbf16>
    %cst_23 = arith.constant dense<0.000000e+00> : vector<8x128xf32>
    %24 = tpu.matmul %22, %23, %cst_23 {dimension_numbers = #tpu.dot_dimension_numbers<[1], [0], [0], [1], [0, 0, 1, 1], [], []>} : vector<8x32xbf16>, vector<32x128xbf16>, vector<8x128xf32> -> vector<8x128xf32>
    %25 = arith.addf %20, %24 : vector<8x128xf32>
    %26 = vector.extract_strided_slice %25 {offsets = [0, 0], sizes = [8, 32], strides = [1, 1]} : vector<8x128xf32> to vector<8x32xf32>
    %27 = arith.negf %26 : vector<8x32xf32>
    %28 = math.exp %27 : vector<8x32xf32>
    %cst_24 = arith.constant 1.000000e+00 : f32
    %29 = vector.broadcast %cst_24 : f32 to vector<8x32xf32>
    %30 = arith.addf %29, %28 : vector<8x32xf32>
    %31 = arith.divf %29, %30 : vector<8x32xf32>
    %32 = vector.extract_strided_slice %25 {offsets = [0, 32], sizes = [8, 32], strides = [1, 1]} : vector<8x128xf32> to vector<8x32xf32>
    %33 = arith.negf %32 : vector<8x32xf32>
    %34 = math.exp %33 : vector<8x32xf32>
    %cst_25 = arith.constant 1.000000e+00 : f32
    %35 = vector.broadcast %cst_25 : f32 to vector<8x32xf32>
    %36 = arith.addf %35, %34 : vector<8x32xf32>
    %37 = arith.divf %35, %36 : vector<8x32xf32>
    %38 = vector.extract_strided_slice %25 {offsets = [0, 64], sizes = [8, 32], strides = [1, 1]} : vector<8x128xf32> to vector<8x32xf32>
    %39 = math.tanh %38 : vector<8x32xf32>
    %40 = vector.extract_strided_slice %25 {offsets = [0, 96], sizes = [8, 32], strides = [1, 1]} : vector<8x128xf32> to vector<8x32xf32>
    %41 = arith.negf %40 : vector<8x32xf32>
    %42 = math.exp %41 : vector<8x32xf32>
    %cst_26 = arith.constant 1.000000e+00 : f32
    %43 = vector.broadcast %cst_26 : f32 to vector<8x32xf32>
    %44 = arith.addf %43, %42 : vector<8x32xf32>
    %45 = arith.divf %43, %44 : vector<8x32xf32>
    %c0_27 = arith.constant 0 : index
    %c0_28 = arith.constant 0 : index
    %46 = vector.load %arg12[%c0_27, %c0_28] : memref<8x32xf32, #tpu.memory_space<vmem>>, vector<8x32xf32>
    %47 = arith.mulf %37, %46 : vector<8x32xf32>
    %48 = arith.mulf %31, %39 : vector<8x32xf32>
    %49 = arith.addf %47, %48 : vector<8x32xf32>
    %50 = math.tanh %49 : vector<8x32xf32>
    %51 = arith.mulf %45, %50 : vector<8x32xf32>
    %c0_29 = arith.constant 0 : index
    %c0_30 = arith.constant 0 : index
    %52 = vector.load %arg12[%c0_29, %c0_30] : memref<8x32xf32, #tpu.memory_space<vmem>>, vector<8x32xf32>
    tpu.vector_store %arg12[%c0_29, %c0_30], %49 {strides = array<i32>} : memref<8x32xf32, #tpu.memory_space<vmem>>, vector<8x32xf32>,
    %c0_31 = arith.constant 0 : index
    %c0_32 = arith.constant 0 : index
    %53 = vector.load %arg11[%c0_31, %c0_32] : memref<8x32xf32, #tpu.memory_space<vmem>>, vector<8x32xf32>
    tpu.vector_store %arg11[%c0_31, %c0_32], %51 {strides = array<i32>} : memref<8x32xf32, #tpu.memory_space<vmem>>, vector<8x32xf32>,
    %54 = arith.index_cast %c0_i32 : i32 to index
    %c0_33 = arith.constant 0 : index
    %c0_34 = arith.constant 0 : index
    %55 = vector.load %arg14[%54, %c0_33, %c0_34] : memref<5x8x32xf32, #tpu.memory_space<vmem>>, vector<1x8x32xf32>
    %56 = vector.shape_cast %55 : vector<1x8x32xf32> to vector<8x32xf32>
    %57 = vector.shape_cast %51 : vector<8x32xf32> to vector<1x8x32xf32>
    tpu.vector_store %arg14[%54, %c0_33, %c0_34], %57 {strides = array<i32>} : memref<5x8x32xf32, #tpu.memory_space<vmem>>, vector<1x8x32xf32>,
    %c1_i32 = arith.constant 1 : i32
    %58 = arith.index_cast %c1_i32 : i32 to index
    %c0_35 = arith.constant 0 : index
    %c0_36 = arith.constant 0 : index
    %59 = vector.load %arg13[%58, %c0_35, %c0_36] : memref<5x8x128xf32, #tpu.memory_space<vmem>>, vector<1x8x128xf32>
    %60 = vector.shape_cast %59 : vector<1x8x128xf32> to vector<8x128xf32>
    %c0_37 = arith.constant 0 : index
    %c0_38 = arith.constant 0 : index
    %61 = vector.load %arg11[%c0_37, %c0_38] : memref<8x32xf32, #tpu.memory_space<vmem>>, vector<8x32xf32>
    %62 = arith.truncf %61 : vector<8x32xf32> to vector<8x32xbf16>
    %c0_39 = arith.constant 0 : index
    %c0_40 = arith.constant 0 : index
    %63 = vector.load %arg6[%c0_39, %c0_40] : memref<32x128xbf16, #tpu.memory_space<vmem>>, vector<32x128xbf16>
    %cst_41 = arith.constant dense<0.000000e+00> : vector<8x128xf32>
    %64 = tpu.matmul %62, %63, %cst_41 {dimension_numbers = #tpu.dot_dimension_numbers<[1], [0], [0], [1], [0, 0, 1, 1], [], []>} : vector<8x32xbf16>, vector<32x128xbf16>, vector<8x128xf32> -> vector<8x128xf32>
    %65 = arith.addf %60, %64 : vector<8x128xf32>
    %66 = vector.extract_strided_slice %65 {offsets = [0, 0], sizes = [8, 32], strides = [1, 1]} : vector<8x128xf32> to vector<8x32xf32>
    %67 = arith.negf %66 : vector<8x32xf32>
    %68 = math.exp %67 : vector<8x32xf32>
    %cst_42 = arith.constant 1.000000e+00 : f32
    %69 = vector.broadcast %cst_42 : f32 to vector<8x32xf32>
    %70 = arith.addf %69, %68 : vector<8x32xf32>
    %71 = arith.divf %69, %70 : vector<8x32xf32>
    %72 = vector.extract_strided_slice %65 {offsets = [0, 32], sizes = [8, 32], strides = [1, 1]} : vector<8x128xf32> to vector<8x32xf32>
    %73 = arith.negf %72 : vector<8x32xf32>
    %74 = math.exp %73 : vector<8x32xf32>
    %cst_43 = arith.constant 1.000000e+00 : f32
    %75 = vector.broadcast %cst_43 : f32 to vector<8x32xf32>
    %76 = arith.addf %75, %74 : vector<8x32xf32>
    %77 = arith.divf %75, %76 : vector<8x32xf32>
    %78 = vector.extract_strided_slice %65 {offsets = [0, 64], sizes = [8, 32], strides = [1, 1]} : vector<8x128xf32> to vector<8x32xf32>
    %79 = math.tanh %78 : vector<8x32xf32>
    %80 = vector.extract_strided_slice %65 {offsets = [0, 96], sizes = [8, 32], strides = [1, 1]} : vector<8x128xf32> to vector<8x32xf32>
    %81 = arith.negf %80 : vector<8x32xf32>
    %82 = math.exp %81 : vector<8x32xf32>
    %cst_44 = arith.constant 1.000000e+00 : f32
    %83 = vector.broadcast %cst_44 : f32 to vector<8x32xf32>
    %84 = arith.addf %83, %82 : vector<8x32xf32>
    %85 = arith.divf %83, %84 : vector<8x32xf32>
    %c0_45 = arith.constant 0 : index
    %c0_46 = arith.constant 0 : index
    %86 = vector.load %arg12[%c0_45, %c0_46] : memref<8x32xf32, #tpu.memory_space<vmem>>, vector<8x32xf32>
    %87 = arith.mulf %77, %86 : vector<8x32xf32>
    %88 = arith.mulf %71, %79 : vector<8x32xf32>
    %89 = arith.addf %87, %88 : vector<8x32xf32>
    %90 = math.tanh %89 : vector<8x32xf32>
    %91 = arith.mulf %85, %90 : vector<8x32xf32>
    %c0_47 = arith.constant 0 : index
    %c0_48 = arith.constant 0 : index
    %92 = vector.load %arg12[%c0_47, %c0_48] : memref<8x32xf32, #tpu.memory_space<vmem>>, vector<8x32xf32>
    tpu.vector_store %arg12[%c0_47, %c0_48], %89 {strides = array<i32>} : memref<8x32xf32, #tpu.memory_space<vmem>>, vector<8x32xf32>,
    %c0_49 = arith.constant 0 : index
    %c0_50 = arith.constant 0 : index
    %93 = vector.load %arg11[%c0_49, %c0_50] : memref<8x32xf32, #tpu.memory_space<vmem>>, vector<8x32xf32>
    tpu.vector_store %arg11[%c0_49, %c0_50], %91 {strides = array<i32>} : memref<8x32xf32, #tpu.memory_space<vmem>>, vector<8x32xf32>,
    %94 = arith.index_cast %c1_i32 : i32 to index
    %c0_51 = arith.constant 0 : index
    %c0_52 = arith.constant 0 : index
    %95 = vector.load %arg14[%94, %c0_51, %c0_52] : memref<5x8x32xf32, #tpu.memory_space<vmem>>, vector<1x8x32xf32>
    %96 = vector.shape_cast %95 : vector<1x8x32xf32> to vector<8x32xf32>
    %97 = vector.shape_cast %91 : vector<8x32xf32> to vector<1x8x32xf32>
    tpu.vector_store %arg14[%94, %c0_51, %c0_52], %97 {strides = array<i32>} : memref<5x8x32xf32, #tpu.memory_space<vmem>>, vector<1x8x32xf32>,
    %c2_i32 = arith.constant 2 : i32
    %98 = arith.index_cast %c2_i32 : i32 to index
    %c0_53 = arith.constant 0 : index
    %c0_54 = arith.constant 0 : index
    %99 = vector.load %arg13[%98, %c0_53, %c0_54] : memref<5x8x128xf32, #tpu.memory_space<vmem>>, vector<1x8x128xf32>
    %100 = vector.shape_cast %99 : vector<1x8x128xf32> to vector<8x128xf32>
    %c0_55 = arith.constant 0 : index
    %c0_56 = arith.constant 0 : index
    %101 = vector.load %arg11[%c0_55, %c0_56] : memref<8x32xf32, #tpu.memory_space<vmem>>, vector<8x32xf32>
    %102 = arith.truncf %101 : vector<8x32xf32> to vector<8x32xbf16>
    %c0_57 = arith.constant 0 : index
    %c0_58 = arith.constant 0 : index
    %103 = vector.load %arg6[%c0_57, %c0_58] : memref<32x128xbf16, #tpu.memory_space<vmem>>, vector<32x128xbf16>
    %cst_59 = arith.constant dense<0.000000e+00> : vector<8x128xf32>
    %104 = tpu.matmul %102, %103, %cst_59 {dimension_numbers = #tpu.dot_dimension_numbers<[1], [0], [0], [1], [0, 0, 1, 1], [], []>} : vector<8x32xbf16>, vector<32x128xbf16>, vector<8x128xf32> -> vector<8x128xf32>
    %105 = arith.addf %100, %104 : vector<8x128xf32>
    %106 = vector.extract_strided_slice %105 {offsets = [0, 0], sizes = [8, 32], strides = [1, 1]} : vector<8x128xf32> to vector<8x32xf32>
    %107 = arith.negf %106 : vector<8x32xf32>
    %108 = math.exp %107 : vector<8x32xf32>
    %cst_60 = arith.constant 1.000000e+00 : f32
    %109 = vector.broadcast %cst_60 : f32 to vector<8x32xf32>
    %110 = arith.addf %109, %108 : vector<8x32xf32>
    %111 = arith.divf %109, %110 : vector<8x32xf32>
    %112 = vector.extract_strided_slice %105 {offsets = [0, 32], sizes = [8, 32], strides = [1, 1]} : vector<8x128xf32> to vector<8x32xf32>
    %113 = arith.negf %112 : vector<8x32xf32>
    %114 = math.exp %113 : vector<8x32xf32>
    %cst_61 = arith.constant 1.000000e+00 : f32
    %115 = vector.broadcast %cst_61 : f32 to vector<8x32xf32>
    %116 = arith.addf %115, %114 : vector<8x32xf32>
    %117 = arith.divf %115, %116 : vector<8x32xf32>
    %118 = vector.extract_strided_slice %105 {offsets = [0, 64], sizes = [8, 32], strides = [1, 1]} : vector<8x128xf32> to vector<8x32xf32>
    %119 = math.tanh %118 : vector<8x32xf32>
    %120 = vector.extract_strided_slice %105 {offsets = [0, 96], sizes = [8, 32], strides = [1, 1]} : vector<8x128xf32> to vector<8x32xf32>
    %121 = arith.negf %120 : vector<8x32xf32>
    %122 = math.exp %121 : vector<8x32xf32>
    %cst_62 = arith.constant 1.000000e+00 : f32
    %123 = vector.broadcast %cst_62 : f32 to vector<8x32xf32>
    %124 = arith.addf %123, %122 : vector<8x32xf32>
    %125 = arith.divf %123, %124 : vector<8x32xf32>
    %c0_63 = arith.constant 0 : index
    %c0_64 = arith.constant 0 : index
    %126 = vector.load %arg12[%c0_63, %c0_64] : memref<8x32xf32, #tpu.memory_space<vmem>>, vector<8x32xf32>
    %127 = arith.mulf %117, %126 : vector<8x32xf32>
    %128 = arith.mulf %111, %119 : vector<8x32xf32>
    %129 = arith.addf %127, %128 : vector<8x32xf32>
    %130 = math.tanh %129 : vector<8x32xf32>
    %131 = arith.mulf %125, %130 : vector<8x32xf32>
    %c0_65 = arith.constant 0 : index
    %c0_66 = arith.constant 0 : index
    %132 = vector.load %arg12[%c0_65, %c0_66] : memref<8x32xf32, #tpu.memory_space<vmem>>, vector<8x32xf32>
    tpu.vector_store %arg12[%c0_65, %c0_66], %129 {strides = array<i32>} : memref<8x32xf32, #tpu.memory_space<vmem>>, vector<8x32xf32>,
    %c0_67 = arith.constant 0 : index
    %c0_68 = arith.constant 0 : index
    %133 = vector.load %arg11[%c0_67, %c0_68] : memref<8x32xf32, #tpu.memory_space<vmem>>, vector<8x32xf32>
    tpu.vector_store %arg11[%c0_67, %c0_68], %131 {strides = array<i32>} : memref<8x32xf32, #tpu.memory_space<vmem>>, vector<8x32xf32>,
    %134 = arith.index_cast %c2_i32 : i32 to index
    %c0_69 = arith.constant 0 : index
    %c0_70 = arith.constant 0 : index
    %135 = vector.load %arg14[%134, %c0_69, %c0_70] : memref<5x8x32xf32, #tpu.memory_space<vmem>>, vector<1x8x32xf32>
    %136 = vector.shape_cast %135 : vector<1x8x32xf32> to vector<8x32xf32>
    %137 = vector.shape_cast %131 : vector<8x32xf32> to vector<1x8x32xf32>
    tpu.vector_store %arg14[%134, %c0_69, %c0_70], %137 {strides = array<i32>} : memref<5x8x32xf32, #tpu.memory_space<vmem>>, vector<1x8x32xf32>,
    %c3_i32 = arith.constant 3 : i32
    %138 = arith.index_cast %c3_i32 : i32 to index
    %c0_71 = arith.constant 0 : index
    %c0_72 = arith.constant 0 : index
    %139 = vector.load %arg13[%138, %c0_71, %c0_72] : memref<5x8x128xf32, #tpu.memory_space<vmem>>, vector<1x8x128xf32>
    %140 = vector.shape_cast %139 : vector<1x8x128xf32> to vector<8x128xf32>
    %c0_73 = arith.constant 0 : index
    %c0_74 = arith.constant 0 : index
    %141 = vector.load %arg11[%c0_73, %c0_74] : memref<8x32xf32, #tpu.memory_space<vmem>>, vector<8x32xf32>
    %142 = arith.truncf %141 : vector<8x32xf32> to vector<8x32xbf16>
    %c0_75 = arith.constant 0 : index
    %c0_76 = arith.constant 0 : index
    %143 = vector.load %arg6[%c0_75, %c0_76] : memref<32x128xbf16, #tpu.memory_space<vmem>>, vector<32x128xbf16>
    %cst_77 = arith.constant dense<0.000000e+00> : vector<8x128xf32>
    %144 = tpu.matmul %142, %143, %cst_77 {dimension_numbers = #tpu.dot_dimension_numbers<[1], [0], [0], [1], [0, 0, 1, 1], [], []>} : vector<8x32xbf16>, vector<32x128xbf16>, vector<8x128xf32> -> vector<8x128xf32>
    %145 = arith.addf %140, %144 : vector<8x128xf32>
    %146 = vector.extract_strided_slice %145 {offsets = [0, 0], sizes = [8, 32], strides = [1, 1]} : vector<8x128xf32> to vector<8x32xf32>
    %147 = arith.negf %146 : vector<8x32xf32>
    %148 = math.exp %147 : vector<8x32xf32>
    %cst_78 = arith.constant 1.000000e+00 : f32
    %149 = vector.broadcast %cst_78 : f32 to vector<8x32xf32>
    %150 = arith.addf %149, %148 : vector<8x32xf32>
    %151 = arith.divf %149, %150 : vector<8x32xf32>
    %152 = vector.extract_strided_slice %145 {offsets = [0, 32], sizes = [8, 32], strides = [1, 1]} : vector<8x128xf32> to vector<8x32xf32>
    %153 = arith.negf %152 : vector<8x32xf32>
    %154 = math.exp %153 : vector<8x32xf32>
    %cst_79 = arith.constant 1.000000e+00 : f32
    %155 = vector.broadcast %cst_79 : f32 to vector<8x32xf32>
    %156 = arith.addf %155, %154 : vector<8x32xf32>
    %157 = arith.divf %155, %156 : vector<8x32xf32>
    %158 = vector.extract_strided_slice %145 {offsets = [0, 64], sizes = [8, 32], strides = [1, 1]} : vector<8x128xf32> to vector<8x32xf32>
    %159 = math.tanh %158 : vector<8x32xf32>
    %160 = vector.extract_strided_slice %145 {offsets = [0, 96], sizes = [8, 32], strides = [1, 1]} : vector<8x128xf32> to vector<8x32xf32>
    %161 = arith.negf %160 : vector<8x32xf32>
    %162 = math.exp %161 : vector<8x32xf32>
    %cst_80 = arith.constant 1.000000e+00 : f32
    %163 = vector.broadcast %cst_80 : f32 to vector<8x32xf32>
    %164 = arith.addf %163, %162 : vector<8x32xf32>
    %165 = arith.divf %163, %164 : vector<8x32xf32>
    %c0_81 = arith.constant 0 : index
    %c0_82 = arith.constant 0 : index
    %166 = vector.load %arg12[%c0_81, %c0_82] : memref<8x32xf32, #tpu.memory_space<vmem>>, vector<8x32xf32>
    %167 = arith.mulf %157, %166 : vector<8x32xf32>
    %168 = arith.mulf %151, %159 : vector<8x32xf32>
    %169 = arith.addf %167, %168 : vector<8x32xf32>
    %170 = math.tanh %169 : vector<8x32xf32>
    %171 = arith.mulf %165, %170 : vector<8x32xf32>
    %c0_83 = arith.constant 0 : index
    %c0_84 = arith.constant 0 : index
    %172 = vector.load %arg12[%c0_83, %c0_84] : memref<8x32xf32, #tpu.memory_space<vmem>>, vector<8x32xf32>
    tpu.vector_store %arg12[%c0_83, %c0_84], %169 {strides = array<i32>} : memref<8x32xf32, #tpu.memory_space<vmem>>, vector<8x32xf32>,
    %c0_85 = arith.constant 0 : index
    %c0_86 = arith.constant 0 : index
    %173 = vector.load %arg11[%c0_85, %c0_86] : memref<8x32xf32, #tpu.memory_space<vmem>>, vector<8x32xf32>
    tpu.vector_store %arg11[%c0_85, %c0_86], %171 {strides = array<i32>} : memref<8x32xf32, #tpu.memory_space<vmem>>, vector<8x32xf32>,
    %174 = arith.index_cast %c3_i32 : i32 to index
    %c0_87 = arith.constant 0 : index
    %c0_88 = arith.constant 0 : index
    %175 = vector.load %arg14[%174, %c0_87, %c0_88] : memref<5x8x32xf32, #tpu.memory_space<vmem>>, vector<1x8x32xf32>
    %176 = vector.shape_cast %175 : vector<1x8x32xf32> to vector<8x32xf32>
    %177 = vector.shape_cast %171 : vector<8x32xf32> to vector<1x8x32xf32>
    tpu.vector_store %arg14[%174, %c0_87, %c0_88], %177 {strides = array<i32>} : memref<5x8x32xf32, #tpu.memory_space<vmem>>, vector<1x8x32xf32>,
    %c4_i32 = arith.constant 4 : i32
    %178 = arith.index_cast %c4_i32 : i32 to index
    %c0_89 = arith.constant 0 : index
    %c0_90 = arith.constant 0 : index
    %179 = vector.load %arg13[%178, %c0_89, %c0_90] : memref<5x8x128xf32, #tpu.memory_space<vmem>>, vector<1x8x128xf32>
    %180 = vector.shape_cast %179 : vector<1x8x128xf32> to vector<8x128xf32>
    %c0_91 = arith.constant 0 : index
    %c0_92 = arith.constant 0 : index
    %181 = vector.load %arg11[%c0_91, %c0_92] : memref<8x32xf32, #tpu.memory_space<vmem>>, vector<8x32xf32>
    %182 = arith.truncf %181 : vector<8x32xf32> to vector<8x32xbf16>
    %c0_93 = arith.constant 0 : index
    %c0_94 = arith.constant 0 : index
    %183 = vector.load %arg6[%c0_93, %c0_94] : memref<32x128xbf16, #tpu.memory_space<vmem>>, vector<32x128xbf16>
    %cst_95 = arith.constant dense<0.000000e+00> : vector<8x128xf32>
    %184 = tpu.matmul %182, %183, %cst_95 {dimension_numbers = #tpu.dot_dimension_numbers<[1], [0], [0], [1], [0, 0, 1, 1], [], []>} : vector<8x32xbf16>, vector<32x128xbf16>, vector<8x128xf32> -> vector<8x128xf32>
    %185 = arith.addf %180, %184 : vector<8x128xf32>
    %186 = vector.extract_strided_slice %185 {offsets = [0, 0], sizes = [8, 32], strides = [1, 1]} : vector<8x128xf32> to vector<8x32xf32>
    %187 = arith.negf %186 : vector<8x32xf32>
    %188 = math.exp %187 : vector<8x32xf32>
    %cst_96 = arith.constant 1.000000e+00 : f32
    %189 = vector.broadcast %cst_96 : f32 to vector<8x32xf32>
    %190 = arith.addf %189, %188 : vector<8x32xf32>
    %191 = arith.divf %189, %190 : vector<8x32xf32>
    %192 = vector.extract_strided_slice %185 {offsets = [0, 32], sizes = [8, 32], strides = [1, 1]} : vector<8x128xf32> to vector<8x32xf32>
    %193 = arith.negf %192 : vector<8x32xf32>
    %194 = math.exp %193 : vector<8x32xf32>
    %cst_97 = arith.constant 1.000000e+00 : f32
    %195 = vector.broadcast %cst_97 : f32 to vector<8x32xf32>
    %196 = arith.addf %195, %194 : vector<8x32xf32>
    %197 = arith.divf %195, %196 : vector<8x32xf32>
    %198 = vector.extract_strided_slice %185 {offsets = [0, 64], sizes = [8, 32], strides = [1, 1]} : vector<8x128xf32> to vector<8x32xf32>
    %199 = math.tanh %198 : vector<8x32xf32>
    %200 = vector.extract_strided_slice %185 {offsets = [0, 96], sizes = [8, 32], strides = [1, 1]} : vector<8x128xf32> to vector<8x32xf32>
    %201 = arith.negf %200 : vector<8x32xf32>
    %202 = math.exp %201 : vector<8x32xf32>
    %cst_98 = arith.constant 1.000000e+00 : f32
    %203 = vector.broadcast %cst_98 : f32 to vector<8x32xf32>
    %204 = arith.addf %203, %202 : vector<8x32xf32>
    %205 = arith.divf %203, %204 : vector<8x32xf32>
    %c0_99 = arith.constant 0 : index
    %c0_100 = arith.constant 0 : index
    %206 = vector.load %arg12[%c0_99, %c0_100] : memref<8x32xf32, #tpu.memory_space<vmem>>, vector<8x32xf32>
    %207 = arith.mulf %197, %206 : vector<8x32xf32>
    %208 = arith.mulf %191, %199 : vector<8x32xf32>
    %209 = arith.addf %207, %208 : vector<8x32xf32>
    %210 = math.tanh %209 : vector<8x32xf32>
    %211 = arith.mulf %205, %210 : vector<8x32xf32>
    %c0_101 = arith.constant 0 : index
    %c0_102 = arith.constant 0 : index
    %212 = vector.load %arg12[%c0_101, %c0_102] : memref<8x32xf32, #tpu.memory_space<vmem>>, vector<8x32xf32>
    tpu.vector_store %arg12[%c0_101, %c0_102], %209 {strides = array<i32>} : memref<8x32xf32, #tpu.memory_space<vmem>>, vector<8x32xf32>,
    %c0_103 = arith.constant 0 : index
    %c0_104 = arith.constant 0 : index
    %213 = vector.load %arg11[%c0_103, %c0_104] : memref<8x32xf32, #tpu.memory_space<vmem>>, vector<8x32xf32>
    tpu.vector_store %arg11[%c0_103, %c0_104], %211 {strides = array<i32>} : memref<8x32xf32, #tpu.memory_space<vmem>>, vector<8x32xf32>,
    %214 = arith.index_cast %c4_i32 : i32 to index
    %c0_105 = arith.constant 0 : index
    %c0_106 = arith.constant 0 : index
    %215 = vector.load %arg14[%214, %c0_105, %c0_106] : memref<5x8x32xf32, #tpu.memory_space<vmem>>, vector<1x8x32xf32>
    %216 = vector.shape_cast %215 : vector<1x8x32xf32> to vector<8x32xf32>
    %217 = vector.shape_cast %211 : vector<8x32xf32> to vector<1x8x32xf32>
    tpu.vector_store %arg14[%214, %c0_105, %c0_106], %217 {strides = array<i32>} : memref<5x8x32xf32, #tpu.memory_space<vmem>>, vector<1x8x32xf32>,
    %c5_i32 = arith.constant 5 : i32
    %c0_107 = arith.constant 0 : index
    %c0_108 = arith.constant 0 : index
    %c0_109 = arith.constant 0 : index
    %218 = vector.load %arg14[%c0_107, %c0_108, %c0_109] : memref<5x8x32xf32, #tpu.memory_space<vmem>>, vector<5x8x32xf32>
    %219 = vector.shape_cast %218 : vector<5x8x32xf32> to vector<40x32xf32>
    %220 = arith.truncf %219 : vector<40x32xf32> to vector<40x32xbf16>
    %c0_110 = arith.constant 0 : index
    %c0_111 = arith.constant 0 : index
    %221 = vector.load %arg7[%c0_110, %c0_111] : memref<32x128xbf16, #tpu.memory_space<vmem>>, vector<32x128xbf16>
    %cst_112 = arith.constant dense<0.000000e+00> : vector<40x128xf32>
    %222 = tpu.matmul %220, %221, %cst_112 {dimension_numbers = #tpu.dot_dimension_numbers<[1], [0], [0], [1], [0, 0, 1, 1], [], []>} : vector<40x32xbf16>, vector<32x128xbf16>, vector<40x128xf32> -> vector<40x128xf32>
    %c0_113 = arith.constant 0 : index
    %c0_114 = arith.constant 0 : index
    %223 = vector.load %arg8[%c0_113, %c0_114] : memref<1x128xf32, #tpu.memory_space<vmem>>, vector<1x128xf32>
    %224 = vector.broadcast %223 : vector<1x128xf32> to vector<40x128xf32>
    %225 = arith.addf %222, %224 : vector<40x128xf32>
    %226 = vector.shape_cast %225 : vector<40x128xf32> to vector<5x8x128xf32>
    %c0_115 = arith.constant 0 : index
    %c0_116 = arith.constant 0 : index
    %c0_117 = arith.constant 0 : index
    %227 = vector.load %arg9[%c0_115, %c0_116, %c0_117] : memref<5x8x128xf32, #tpu.memory_space<vmem>>, vector<5x8x128xf32>
    tpu.vector_store %arg9[%c0_115, %c0_116, %c0_117], %226 {strides = array<i32>} : memref<5x8x128xf32, #tpu.memory_space<vmem>>, vector<5x8x128xf32>,
    %c0_118 = arith.constant 0 : index
    %c0_119 = arith.constant 0 : index
    %228 = vector.load %arg3[%c0_118, %c0_119] : memref<8x1xf32, #tpu.memory_space<vmem>>, vector<8x1xf32>
    %229 = tpu.iota {dimensions = array<i32: 0>} : vector<5x8x1xi32>
    %230 = arith.sitofp %229 : vector<5x8x1xi32> to vector<5x8x1xf32>
    %231 = vector.shape_cast %228 : vector<8x1xf32> to vector<1x8x1xf32>
    %232 = vector.broadcast %231 : vector<1x8x1xf32> to vector<5x8x1xf32>
    %233 = arith.cmpf olt, %230, %232 : vector<5x8x1xf32>
    %234 = arith.extui %233 : vector<5x8x1xi1> to vector<5x8x1xi32>
    %235 = arith.sitofp %234 : vector<5x8x1xi32> to vector<5x8x1xf32>
    %236 = tpu.reciprocal %228 {approx = true} : vector<8x1xf32> -> vector<8x1xf32>
    %237 = vector.broadcast %235 : vector<5x8x1xf32> to vector<5x8x128xf32>
    %238 = arith.mulf %226, %237 : vector<5x8x128xf32>
    %cst_120 = arith.constant dense<0.000000e+00> : vector<8x128xf32>
    %239 = vector.multi_reduction <add>, %238, %cst_120 [0] : vector<5x8x128xf32> to vector<8x128xf32>
    %240 = vector.broadcast %236 : vector<8x1xf32> to vector<8x128xf32>
    %241 = arith.mulf %239, %240 : vector<8x128xf32>
    %c0_121 = arith.constant 0 : index
    %c0_122 = arith.constant 0 : index
    %242 = vector.load %arg10[%c0_121, %c0_122] : memref<8x128xf32, #tpu.memory_space<vmem>>, vector<8x128xf32>
    tpu.vector_store %arg10[%c0_121, %c0_122], %241 {strides = array<i32>} : memref<8x128xf32, #tpu.memory_space<vmem>>, vector<8x128xf32>,
    return
  }
  func.func @transform_0(%arg0: i32) -> (i32, i32, i32) {
    %c0_i32 = arith.constant 0 : i32
    %c0_i32_0 = arith.constant 0 : i32
    %c0_i32_1 = arith.constant 0 : i32
    return %c0_i32, %arg0, %c0_i32_0 : i32, i32, i32
  }
  func.func @transform_1(%arg0: i32) -> (i32, i32) {
    %c0_i32 = arith.constant 0 : i32
    %c0_i32_0 = arith.constant 0 : i32
    %c0_i32_1 = arith.constant 0 : i32
    return %c0_i32, %c0_i32_0 : i32, i32
  }
  func.func @transform_2(%arg0: i32) -> (i32, i32) {
    %c0_i32 = arith.constant 0 : i32
    %c0_i32_0 = arith.constant 0 : i32
    return %arg0, %c0_i32 : i32, i32
  }
  func.func @transform_3(%arg0: i32) -> (i32, i32) {
    %c0_i32 = arith.constant 0 : i32
    %c0_i32_0 = arith.constant 0 : i32
    %c0_i32_1 = arith.constant 0 : i32
    return %c0_i32, %c0_i32_0 : i32, i32
  }
  func.func @transform_4(%arg0: i32) -> (i32, i32) {
    %c0_i32 = arith.constant 0 : i32
    %c0_i32_0 = arith.constant 0 : i32
    %c0_i32_1 = arith.constant 0 : i32
    return %c0_i32, %c0_i32_0 : i32, i32
  }
  func.func @transform_5(%arg0: i32) -> (i32, i32) {
    %c0_i32 = arith.constant 0 : i32
    %c0_i32_0 = arith.constant 0 : i32
    %c0_i32_1 = arith.constant 0 : i32
    return %c0_i32, %c0_i32_0 : i32, i32
  }
  func.func @transform_6(%arg0: i32) -> (i32, i32) {
    %c0_i32 = arith.constant 0 : i32
    %c0_i32_0 = arith.constant 0 : i32
    %c0_i32_1 = arith.constant 0 : i32
    return %c0_i32, %c0_i32_0 : i32, i32
  }
  func.func @transform_7(%arg0: i32) -> (i32, i32) {
    %c0_i32 = arith.constant 0 : i32
    %c0_i32_0 = arith.constant 0 : i32
    %c0_i32_1 = arith.constant 0 : i32
    return %c0_i32, %c0_i32_0 : i32, i32
  }
  func.func @transform_8(%arg0: i32) -> (i32, i32, i32) {
    %c0_i32 = arith.constant 0 : i32
    %c0_i32_0 = arith.constant 0 : i32
    %c0_i32_1 = arith.constant 0 : i32
    return %c0_i32, %arg0, %c0_i32_0 : i32, i32, i32
  }
  func.func @transform_9(%arg0: i32) -> (i32, i32) {
    %c0_i32 = arith.constant 0 : i32
    %c0_i32_0 = arith.constant 0 : i32
    return %arg0, %c0_i32 : i32, i32
  }
}

</mosaic_0001>

<bundles_post_ra>
// kernel: tpu_custom_call.1
= control target key start
LH: loop header
LB: loop body
LE: loop exit
PB: predicated region body
PF: predicated region fallthrough
CT: control target
= control target key end

     0   :  { %15 = vsyncpa [#allocation7], 0  ;;  %s1689_s0 = inlined_call_operand.hbm [shape: bf16[5,8,128], index: 0, kind: input, shape index: {}]   ;;  %s1690_s1 = inlined_call_operand.hbm [shape: f32[5,128], index: 1, kind: input, shape index: {}]   ;;  %s1691_s2 = inlined_call_operand.vmem [shape: f32[8,1], index: 2, kind: input, shape index: {}]   ;;  %s1692_s3 = inlined_call_operand.hbm [shape: bf16[128,128], index: 3, kind: input, shape index: {}]   ;;  %s1693_s4 = inlined_call_operand.vmem [shape: f32[1,128], index: 4, kind: input, shape index: {}]   ;;  %s1694_s5 = inlined_call_operand.vmem [shape: bf16[32,128], index: 5, kind: input, shape index: {}]   ;;  %s1695_s6 = inlined_call_operand.hbm [shape: bf16[32,128], index: 6, kind: input, shape index: {}]   ;;  %s1696_s7 = inlined_call_operand.vmem [shape: f32[1,128], index: 7, kind: input, shape index: {}]   ;;  %s1697_s8 = inlined_call_operand.hbm [shape: f32[5,8,128], index: 8, kind: output, shape index: {0}]   ;;  %s1698_s9 = inlined_call_operand.hbm [shape: f32[8,128], index: 9, kind: output, shape index: {1}]  }
   0x1   :  { %16 = vsyncpa [#allocation10], 0 }
   0x2   :  { %17 = vsyncpa [#allocation13], 0 }
   0x3   :  { %18 = vsyncpa [#allocation8], 0 }
   0x4   :  { %19 = vsyncpa [#allocation16], 0  ;;  %s1421_s30 = smov [#allocation9]   ;;  %s1422_s11 = smov [#allocation6]  }
   0x5   :  { %s38_s10 = sshll.u32 %s1421_s30, 4  ;;  %s25_s12 = sshll.u32 %s1422_s11, 4  ;;  %s39_s10 = int_to_ptr.vmem [resolvable:$true] %s38_s10  ;;  %s26_s12 = int_to_ptr.vmem [resolvable:$true] %s25_s12 }
   0x6   :  { %s1299_s13 = scalar_lea.vmem %s39_s10, 128  ;;  %p1304_p1 = scmp.lt.s32.totalorder %s39_s10, %s39_s10 }
   0x7   :  { %p1300_p0 = scmp.ne.s32.totalorder %s39_s10, %s1299_s13  ;;  %p1305_p2 = scmp.lt.s32.totalorder %s1299_s13, %s1299_s13 }
   0x9   :  { %p1306_p3 = por %p1305_p2, %p1304_p1 }
   0xb   :  { %p1307_p4 = pnand %p1306_p3, %p1300_p0 }
   0xd   :  { %1310 = shalt.err (!%p1307_p4)
}
   0xe   :  { %41 = dma.hbm_to_vmem [thread:$0]  %s1690_s1, 128, %s39_s10, [#allocation10]  }
   0xf   :  { %s1319_s16 = scalar_lea.vmem %s26_s12, 320  ;;  %p1324_p6 = scmp.lt.s32.totalorder %s26_s12, %s26_s12 }
  0x10   :  { %p1320_p5 = scmp.ne.s32.totalorder %s26_s12, %s1319_s16  ;;  %p1325_p7 = scmp.lt.s32.totalorder %s1319_s16, %s1319_s16 }
  0x12   :  { %p1326_p8 = por %p1325_p7, %p1324_p6 }
  0x14   :  { %p1327_p9 = pnand %p1326_p8, %p1320_p5 }
  0x16   :  { %1330 = shalt.err (!%p1327_p9)
}
  0x17   :  { %s1423_s17 = smov 64   ;;  %s1424_s18 = smov 4  }
  0x18   :  { %31 = dma.hbm_to_vmem [thread:$0]  %s1689_s0, 320, %s26_s12, [#allocation7], %s1423_s17, %s1423_s17, %s1424_s18  }
  0x19   :  { %s1425_s21 = smov [#allocation11]   ;;  %s1426_s23 = smov [#allocation12]  }
  0x1a   :  { %s49_s22 = sshll.u32 %s1425_s21, 4  ;;  %s65_s24 = sshll.u32 %s1426_s23, 4  ;;  %s50_s22 = int_to_ptr.vmem [resolvable:$true] %s49_s22  ;;  %s66_s24 = int_to_ptr.vmem [resolvable:$true] %s65_s24 }
  0x1b   :  { %s1339_s1 = scalar_lea.vmem %s50_s22, 1024  ;;  %p1344_p11 = scmp.lt.s32.totalorder %s50_s22, %s50_s22 }
  0x1c   :  { %p1340_p10 = scmp.ne.s32.totalorder %s50_s22, %s1339_s1  ;;  %p1345_p12 = scmp.lt.s32.totalorder %s1339_s1, %s1339_s1 }
  0x1e   :  { %p1346_p13 = por %p1345_p12, %p1344_p11 }
  0x20   :  { %p1347_p0 = pnand %p1346_p13, %p1340_p10 }
  0x22   :  { %1350 = shalt.err (!%p1347_p0)
}
  0x23   :  { %55 = dma.hbm_to_vmem [thread:$0]  %s1692_s3, 1024, %s50_s22, [#allocation10], %s1423_s17, %s1423_s17, %s1424_s18  }
  0x24   :  { %s1359_s0 = scalar_lea.vmem %s66_s24, 256  ;;  %p1364_p2 = scmp.lt.s32.totalorder %s66_s24, %s66_s24 }
  0x25   :  { %p1360_p1 = scmp.ne.s32.totalorder %s66_s24, %s1359_s0  ;;  %p1365_p3 = scmp.lt.s32.totalorder %s1359_s0, %s1359_s0 }
  0x27   :  { %p1366_p4 = por %p1365_p3, %p1364_p2 }
  0x29   :  { %p1367_p5 = pnand %p1366_p4, %p1360_p1 }
  0x2b   :  { %1370 = shalt.err (!%p1367_p5)
}
  0x2c   :  { %71 = dma.hbm_to_vmem [thread:$0]  %s1695_s6, 256, %s66_s24, [#allocation13], %s1423_s17, %s1423_s17, %s1424_s18  }
  0x2d   :  { %1411 = dma.done.wait [#allocation7], 320  }
  0x2e   :  { %1412 = vsyncadd [#allocation7], 4294966976 }
  0x2f   :  { %1413 = dma.done.wait [#allocation10], 1152  }
  0x30   :  { %1414 = vsyncadd [#allocation10], 4294966144 }
  0x31   :  { %1415 = dma.done.wait [#allocation13], 256  }
  0x32   :  { %1416 = vsyncadd [#allocation13], 4294967040  ;;  %vm316_vm0 = vcmask 261120   ;;  %v1427_v0 = vmov 0.0   ;;  %vm1428_vm1 = vmmov 0   ;;  %v1225_v1 = vld [vmem:[#allocation11 + $0x38] sm:$0xff]   ;;  %v234_v18 = vlaneseq }
  0x33   :  { %1118 = vmatprep.subr.bf16.mxu0 %v1427_v0  ;;  %1134 = vmatprep.mubr.msk.bf16.mxu0 %vm1428_vm1, %v1427_v0  ;;  %317 = vst.msk [vmem:[#allocation2] sm:$0xff] %vm316_vm0, %v1427_v0  ;;  %318 = vst.msk [vmem:[#allocation3] sm:$0xff] %vm316_vm0, %v1427_v0  ;;  %v1226_v2 = vld [vmem:[#allocation11 + $0x30] sm:$0xff]   ;;  %v1227_v3 = vld [vmem:[#allocation11 + $0x28] sm:$0xff]   ;;  %v1429_v16 = vmov 1966171168  }
  0x34   :  { %1154 = vmatprep.subr.bf16.mxu1 %v1427_v0  ;;  %1158 = vmatprep.mubr.msk.bf16.mxu1 %vm1428_vm1, %v1427_v0  ;;  %v1228_v4 = vld [vmem:[#allocation11 + $0x20] sm:$0xff]   ;;  %v1229_v5 = vld [vmem:[#allocation11 + $0x18] sm:$0xff]   ;;  %v1230_v6 = vld [vmem:[#allocation11 + $0x10] sm:$0xff]   ;;  %v232_v17 = vunpack.c.l.s4 %v1429_v16  ;;  %v235_v20 = vshrl.u32 %v234_v18, 7  ;;  %s1431_s12 = smov 96   ;;  %s1434_s6 = smov [#allocation15]  }
  0x35   :  { %1119 = vmatpush3.bf16.msra.mxu0 %v1225_v1  ;;  %v1231_v7 = vld [vmem:[#allocation11 + $0x8] sm:$0xff]   ;;  %v1232_v8 = vld [vmem:[#allocation11] sm:$0xff]   ;;  %v1234_v10 = vld [vmem:[%s1694_s5 + $0x8] sm:$0xff]   ;;  %s1024_s29 = sshll.u32 %s1434_s6, 4  ;;  %s1025_s29 = int_to_ptr.vmem [resolvable:$true] %s1024_s29 }
  0x36   :  { %1120 = vmatprep.subr.bf16.mxu0 %v1427_v0  ;;  %v1233_v9 = vld [vmem:[#allocation6] sm:$0xff]   ;;  %v1236_v11 = vld [vmem:[%s1694_s5] sm:$0xff]   ;;  %v1237_v13 = vld [vmem:[#allocation6 + $0x10] ss:$0 sps:$4 sm:$0xff]   ;;  %v233_v19 = vunpack.c.0.s8 %v232_v17  ;;  %v271_v25 = vsub.s32 0, %v235_v20 }
  0x37   :  { %v1235_v12 = vld [vmem:[#allocation6 + $0x8] sm:$0xff]   ;;  %v228_v22 = vld [vmem:[#allocation9] sm:$0x1f] }
  0x38   :  { %v236_v21 = vsub.s32 %v233_v19, %v235_v20  ;;  %v230_v32 = vcombine.high %v228_v22, %v228_v22  ;;  %v1050_v42 = vld [vmem:[%s1693_s4] ss:$0 sm:$0xff]  ;;  %s1430_s4 = smov 32   ;;  %v1239_v16 = vld [vmem:[%s1694_s5 + $0x8] sm:$0xff]  }
  0x39   :  { %1121 = vmatpush3.bf16.msra.mxu0 %v1226_v2  ;;  %1155 = vmatpush3.bf16.msra.mxu1 %v1239_v16  ;;  %v1240_v17 = vld [vmem:[%s1694_s5] sm:$0xff]  }
  0x3a   :  { %1122 = vmatprep.subr.bf16.mxu0 %v1427_v0  ;;  %v320_v14 = vld [vmem:[#allocation2] sm:$0xff]  ;;  %v237_v23 = vrot.slane %v228_v22, %v236_v21  ;;  %v244_v34 = vrot.slane %v230_v32, %v236_v21  ;;  %1156 = vmatprep.subr.bf16.mxu1 %v1427_v0 }
  0x3b   :  { %v321_v15 = vpack.c.bf16 %v320_v14, %v320_v14 }
  0x3c   :  { %v245_v24 = vcombine.high %v237_v23, %v237_v23  ;;  %v252_v27 = vrot.slane %v237_v23, %v236_v21  ;;  %v259_v35 = vrot.slane %v244_v34, %v236_v21 }
  0x3d   :  { %1123 = vmatpush3.bf16.msra.mxu0 %v1227_v3  ;;  %1157 = vmatpush3.bf16.msra.mxu1 %v1240_v17 }
  0x3e   :  { %1124 = vmatprep.subr.bf16.mxu0 %v1427_v0  ;;  %v266_v26 = vrot.slane %v245_v24, %v236_v21  ;;  %v267_v29 = vcombine.high %v252_v27, %v252_v27  ;;  %v288_v36 = vrot.slane %v259_v35, %v271_v25  ;;  %v272_v51 = vrot.slane %v252_v27, %v271_v25 }
  0x3f   :  { %1162 = vmatprep.subr.bf16.mxu1 %v1427_v0 }
  0x40   :  { %v276_v28 = vrot.slane %v266_v26, %v271_v25  ;;  %v280_v30 = vrot.slane %v267_v29, %v271_v25  ;;  %v268_v31 = vcombine.high %v266_v26, %v266_v26 }
  0x41   :  { %1125 = vmatpush3.bf16.msra.mxu0 %v1228_v4  ;;  %v389_v4 = vld [vmem:[#allocation3] sm:$0xff] }
  0x42   :  { %1126 = vmatprep.subr.bf16.mxu0 %v1427_v0  ;;  %v284_v33 = vrot.slane %v268_v31, %v271_v25 }
  0x45   :  { %1127 = vmatpush3.bf16.msra.mxu0 %v1229_v5 }
  0x46   :  { %1128 = vmatprep.subr.bf16.mxu0 %v1427_v0 }
  0x49   :  { %1129 = vmatpush3.bf16.msra.mxu0 %v1230_v6 }
  0x4a   :  { %1130 = vmatprep.subr.bf16.mxu0 %v1427_v0 }
  0x4d   :  { %1131 = vmatpush3.bf16.msra.mxu0 %v1231_v7 }
  0x4e   :  { %1132 = vmatprep.subr.bf16.mxu0 %v1427_v0 }
  0x51   :  { %1133 = vmatpush3.bf16.msra.mxu0 %v1232_v8 }
  0x52   :  { %1146 = vmatprep.subr.bf16.mxu0 %v1427_v0 }
  0x54   :  { %1135 = vmatmul.mubr.bf16.vlgmr.msra.gmra.mxu0 %v1233_v9 }
  0x55   :  { %1147 = vmatpush3.bf16.msra.mxu0 %v1234_v10  ;;  %1138 = vmatprep.mubr.msk.bf16.mxu0 %vm1428_vm1, %v1427_v0 }
  0x56   :  { %1148 = vmatprep.subr.bf16.mxu0 %v1427_v0 }
  0x59   :  { %1149 = vmatpush3.bf16.msra.mxu0 %v1236_v11 }
  0x5c   :  { %1139 = vmatmul.mubr.bf16.gmra.mxu0 %v1235_v12 }
  0x5d   :  { %1142 = vmatprep.mubr.msk.bf16.mxu0 %vm1428_vm1, %v1427_v0 }
  0x64   :  { %1143 = vmatmul.mubr.bf16.gmra.mxu0 %v1237_v13 }
  0x65   :  { %1150 = vmatprep.mubr.msk.bf16.mxu0 %vm1428_vm1, %v1427_v0 }
  0x6c   :  { %1151 = vmatmul.mubr.msk.bf16.vlgmr.msra.gmra.mxu0 %vm316_vm0, %v321_v15 }
 0x114   :  { %v206_v37 = vpop.f32.mrf.mxu0 }
 0x115   :  { %v294_v56 = vadd.f32 %v272_v51, %v206_v37 }
 0x116   :  { %v1136_v38 = vpop.f32.mrf.mxu0 }
 0x117   :  { %v306_v60 = vadd.f32 %v1050_v42, %v294_v56 }
 0x118   :  { %v209_v39 = vpop.f32.mrf.mxu0 }
 0x119   :  { %v295_v40 = vadd.f32 %v276_v28, %v209_v39 }
 0x11a   :  { %v1137_v41 = vpop.f32.mrf.mxu0 }
 0x11b   :  { %v1540_v43 = vadd.f32 %v1050_v42, %v295_v40 }
 0x11c   :  { %v214_v44 = vpop.f32.mrf.mxu0 }
 0x11d   :  { %v296_v45 = vadd.f32 %v280_v30, %v214_v44 }
 0x11e   :  { %v1140_v46 = vpop.f32.mrf.mxu0 }
 0x11f   :  { %v1542_v47 = vadd.f32 %v1050_v42, %v296_v45 }
 0x120   :  { %v217_v48 = vpop.f32.mrf.mxu0 }
 0x121   :  { %v297_v49 = vadd.f32 %v284_v33, %v217_v48 }
 0x122   :  { %v1141_v50 = vpop.f32.mrf.mxu0 }
 0x123   :  { %v1544_v52 = vadd.f32 %v1050_v42, %v297_v49 }
 0x124   :  { %v222_v53 = vpop.f32.mrf.mxu0 }
 0x125   :  { %v298_v54 = vadd.f32 %v288_v36, %v222_v53 }
 0x126   :  { %v1144_v55 = vpop.f32.mrf.mxu0 }
 0x127   :  { %v1546_v57 = vadd.f32 %v1050_v42, %v298_v54  ;;  %v1241_v42 = vld [vmem:[%s1694_s5 + $0x8] sm:$0xff]  }
 0x128   :  { %v225_v58 = vpop.f32.mrf.mxu0 }
 0x12a   :  { %v1145_v59 = vpop.f32.mrf.mxu0 }
 0x12c   :  { %v375_v61 = vpop.f32.mrf.mxu0 }
 0x12d   :  { %v381_v62 = vadd.f32 %v375_v61, %v306_v60 }
 0x12e   :  { %v1152_v63 = vpop.f32.mrf.mxu0 }
 0x12f   :  { %1249 = vtanh.f32 %v381_v62  ;;  %v1054_v5 = vmul.f32 -1.442695, %v381_v62 }
 0x130   :  { %v378_v1 = vpop.f32.mrf.mxu0 }
 0x131   :  { %1251 = vpow2.f32 %v1054_v5 }
 0x132   :  { %v1153_v2 = vpop.f32.mrf.mxu0 }
 0x13c   :  { %v1250_v3 = vpop.eup %1249 }
 0x13d   :  { %396 = vrot.lane.b32.xlu0 %v1250_v3, %s1423_s17 }
 0x13e   :  { %v1252_v6 = vpop.eup %1251 }
 0x13f   :  { %v385_v7 = vadd.f32 1.0, %v1252_v6 }
 0x141   :  { %391 = vrot.lane.b32.xlu0 %v389_v4, %s1430_s4  ;;  %1253 = vrcp.f32 %v385_v7  ;;  %v1243_v7 = vld [vmem:[%s1694_s5 + $0x8] sm:$0xff]  }
 0x14e   :  { %v1254_v8 = vpop.eup %1253 }
 0x1af   :  { %v397_v9 = vpop.permute.xlu0 %396 }
 0x1b0   :  { %v399_v10 = vmul.f32 %v1254_v8, %v397_v9 }
 0x1b2   :  { %401 = vrot.lane.b32.xlu1 %v399_v10, %s1430_s4 }
 0x1b3   :  { %v392_v11 = vpop.permute.xlu0 %391 }
 0x1b4   :  { %v394_v12 = vmul.f32 %v1254_v8, %v392_v11 }
 0x224   :  { %v402_v13 = vpop.permute.xlu1 %401 }
 0x225   :  { %v404_v14 = vadd.f32 %v402_v13, %v394_v12 }
 0x227   :  { %1255 = vtanh.f32 %v404_v14 }
 0x234   :  { %v1256_v15 = vpop.eup %1255 }
 0x235   :  { %407 = vrot.lane.b32.xlu1 %v1256_v15, %s1423_s17 }
 0x239   :  { %412 = vrot.lane.b32.xlu1 %v404_v14, %s1431_s12 }
 0x2a7   :  { %v408_v18 = vpop.permute.xlu1 %407 }
 0x2a8   :  { %v410_v19 = vmul.f32 %v1254_v8, %v408_v18  ;;  %v1244_v8 = vld [vmem:[%s1694_s5] sm:$0xff]  }
 0x2aa   :  { %417 = vrot.lane.b32.xlu0 %v410_v19, %s1430_s4 }
 0x2ab   :  { %v413_v20 = vpop.permute.xlu1 %412 }
 0x2ac   :  { %415 = vst.msk [vmem:[#allocation3] sm:$0xff] %vm316_vm0, %v413_v20 }
 0x2b3   :  { %v493_v21 = vld [vmem:[#allocation3] sm:$0xff] }
 0x2b4   :  { %495 = vrot.lane.b32.xlu1 %v493_v21, %s1430_s4 }
 0x31c   :  { %v418_v22 = vpop.permute.xlu0 %417 }
 0x31d   :  { %420 = vst.msk [vmem:[#allocation2] sm:$0xff] %vm316_vm0, %v418_v22  ;;  %421 = vst.msk [vmem:[#allocation5] sm:$0xff] %vm316_vm0, %v418_v22 }
 0x324   :  { %v424_v23 = vld [vmem:[#allocation2] sm:$0xff] }
 0x325   :  { %v425_v24 = vpack.c.bf16 %v424_v23, %v424_v23 }
 0x326   :  { %v496_v37 = vpop.permute.xlu1 %495 }
 0x327   :  { %1159 = vmatmul.mubr.msk.bf16.vlgmr.msra.gmra.mxu1 %vm316_vm0, %v425_v24 }
 0x328   :  { %1166 = vmatprep.mubr.msk.bf16.mxu1 %vm1428_vm1, %v1427_v0  ;;  %1163 = vmatpush3.bf16.msra.mxu1 %v1241_v42  ;;  %v1248_v42 = vld [vmem:[#allocation12] sm:$0xff]  }
 0x329   :  { %1164 = vmatprep.subr.bf16.mxu1 %v1427_v0 }
 0x3e7   :  { %v479_v25 = vpop.f32.mrf.mxu1 }
 0x3e8   :  { %v485_v26 = vadd.f32 %v479_v25, %v1540_v43  ;;  %v1242_v43 = vld [vmem:[%s1694_s5] sm:$0xff]  }
 0x3e9   :  { %v1160_v27 = vpop.f32.mrf.mxu1  ;;  %1165 = vmatpush3.bf16.msra.mxu1 %v1242_v43 }
 0x3ea   :  { %1257 = vtanh.f32 %v485_v26  ;;  %v1058_v31 = vmul.f32 -1.442695, %v485_v26  ;;  %1170 = vmatprep.subr.bf16.mxu1 %v1427_v0 }
 0x3eb   :  { %v482_v28 = vpop.f32.mrf.mxu1 }
 0x3ec   :  { %1259 = vpow2.f32 %v1058_v31 }
 0x3ed   :  { %v1161_v29 = vpop.f32.mrf.mxu1 }
 0x3f7   :  { %v1258_v30 = vpop.eup %1257 }
 0x3f8   :  { %500 = vrot.lane.b32.xlu0 %v1258_v30, %s1423_s17 }
 0x3f9   :  { %v1260_v32 = vpop.eup %1259 }
 0x3fa   :  { %v489_v33 = vadd.f32 1.0, %v1260_v32  ;;  %v1245_v32 = vld [vmem:[%s1694_s5 + $0x8] sm:$0xff]  }
 0x3fc   :  { %1261 = vrcp.f32 %v489_v33  ;;  %v1246_v33 = vld [vmem:[%s1694_s5] sm:$0xff]  }
 0x409   :  { %v1262_v34 = vpop.eup %1261 }
 0x40a   :  { %v498_v38 = vmul.f32 %v1262_v34, %v496_v37 }
 0x46a   :  { %v501_v35 = vpop.permute.xlu0 %500 }
 0x46b   :  { %v503_v36 = vmul.f32 %v1262_v34, %v501_v35 }
 0x46d   :  { %505 = vrot.lane.b32.xlu0 %v503_v36, %s1430_s4 }
 0x4df   :  { %v506_v39 = vpop.permute.xlu0 %505 }
 0x4e0   :  { %v508_v40 = vadd.f32 %v506_v39, %v498_v38 }
 0x4e2   :  { %1263 = vtanh.f32 %v508_v40 }
 0x4ef   :  { %v1264_v41 = vpop.eup %1263 }
 0x4f0   :  { %511 = vrot.lane.b32.xlu1 %v1264_v41, %s1423_s17 }
 0x4f4   :  { %516 = vrot.lane.b32.xlu1 %v508_v40, %s1431_s12  ;;  %v1247_v40 = vld [vmem:[#allocation12 + $0x8] sm:$0xff]  }
 0x562   :  { %v512_v44 = vpop.permute.xlu1 %511 }
 0x563   :  { %v514_v45 = vmul.f32 %v1262_v34, %v512_v44  ;;  %v842_v44 = vld [vmem:[#allocation5] sm:$0xff] }
 0x565   :  { %521 = vrot.lane.b32.xlu0 %v514_v45, %s1430_s4 }
 0x566   :  { %v517_v46 = vpop.permute.xlu1 %516 }
 0x567   :  { %519 = vst.msk [vmem:[#allocation3] sm:$0xff] %vm316_vm0, %v517_v46 }
 0x56e   :  { %v598_v48 = vld [vmem:[#allocation3] sm:$0xff] }
 0x56f   :  { %600 = vrot.lane.b32.xlu1 %v598_v48, %s1430_s4 }
 0x5d7   :  { %v522_v49 = vpop.permute.xlu0 %521 }
 0x5d8   :  { %524 = vst.msk [vmem:[#allocation2] sm:$0xff] %vm316_vm0, %v522_v49  ;;  %526 = vst.msk [vmem:[#allocation5 + $0x8] sm:$0xff] %vm316_vm0, %v522_v49 }
 0x5df   :  { %v529_v50 = vld [vmem:[#allocation2] sm:$0xff]  ;;  %v843_v43 = vld [vmem:[#allocation5 + $0x8] sm:$0xff] }
 0x5e0   :  { %v530_v51 = vpack.c.bf16 %v529_v50, %v529_v50  ;;  %v847_v45 = vpack.c.bf16 %v843_v43, %v842_v44 }
 0x5e1   :  { %v601_v3 = vpop.permute.xlu1 %600 }
 0x5e2   :  { %1167 = vmatmul.mubr.msk.bf16.vlgmr.msra.gmra.mxu1 %vm316_vm0, %v530_v51 }
 0x5e3   :  { %1174 = vmatprep.mubr.msk.bf16.mxu1 %vm1428_vm1, %v1427_v0  ;;  %1171 = vmatpush3.bf16.msra.mxu1 %v1243_v7 }
 0x5e4   :  { %1172 = vmatprep.subr.bf16.mxu1 %v1427_v0 }
 0x5e7   :  { %1173 = vmatpush3.bf16.msra.mxu1 %v1244_v8 }
 0x5e8   :  { %1178 = vmatprep.subr.bf16.mxu1 %v1427_v0 }
 0x6a2   :  { %v584_v53 = vpop.f32.mrf.mxu1 }
 0x6a3   :  { %v590_v54 = vadd.f32 %v584_v53, %v1542_v47 }
 0x6a4   :  { %v1168_v55 = vpop.f32.mrf.mxu1 }
 0x6a5   :  { %1265 = vtanh.f32 %v590_v54  ;;  %v1062_v60 = vmul.f32 -1.442695, %v590_v54 }
 0x6a6   :  { %v587_v56 = vpop.f32.mrf.mxu1 }
 0x6a7   :  { %1267 = vpow2.f32 %v1062_v60  ;;  %v1643_v56 = vld [vmem:[%s1696_s7] ss:$0 sm:$0xff] }
 0x6a8   :  { %v1169_v58 = vpop.f32.mrf.mxu1 }
 0x6b2   :  { %v1266_v59 = vpop.eup %1265 }
 0x6b3   :  { %605 = vrot.lane.b32.xlu0 %v1266_v59, %s1423_s17 }
 0x6b4   :  { %v1268_v61 = vpop.eup %1267 }
 0x6b5   :  { %v594_v62 = vadd.f32 1.0, %v1268_v61 }
 0x6b7   :  { %1269 = vrcp.f32 %v594_v62 }
 0x6c4   :  { %v1270_v63 = vpop.eup %1269 }
 0x6c5   :  { %v603_v4 = vmul.f32 %v1270_v63, %v601_v3 }
 0x725   :  { %v606_v1 = vpop.permute.xlu0 %605 }
 0x726   :  { %v608_v2 = vmul.f32 %v1270_v63, %v606_v1 }
 0x728   :  { %610 = vrot.lane.b32.xlu0 %v608_v2, %s1430_s4 }
 0x79a   :  { %v611_v47 = vpop.permute.xlu0 %610 }
 0x79b   :  { %v613_v5 = vadd.f32 %v611_v47, %v603_v4 }
 0x79d   :  { %1271 = vtanh.f32 %v613_v5 }
 0x7aa   :  { %v1272_v6 = vpop.eup %1271 }
 0x7ab   :  { %616 = vrot.lane.b32.xlu1 %v1272_v6, %s1423_s17 }
 0x7af   :  { %621 = vrot.lane.b32.xlu1 %v613_v5, %s1431_s12 }
 0x81d   :  { %v617_v9 = vpop.permute.xlu1 %616 }
 0x81e   :  { %v619_v10 = vmul.f32 %v1270_v63, %v617_v9 }
 0x820   :  { %626 = vrot.lane.b32.xlu0 %v619_v10, %s1430_s4 }
 0x821   :  { %v622_v11 = vpop.permute.xlu1 %621 }
 0x822   :  { %624 = vst.msk [vmem:[#allocation3] sm:$0xff] %vm316_vm0, %v622_v11 }
 0x829   :  { %v703_v12 = vld [vmem:[#allocation3] sm:$0xff] }
 0x82a   :  { %705 = vrot.lane.b32.xlu1 %v703_v12, %s1430_s4  ;;  %v1432_v12 = vmov 0  }
 0x82b   :  { %1218 = vset.pattern.permute.xlu1 %v1432_v12  ;;  %1224 = vset.pattern.permute.xlu0 %v1432_v12 }
 0x892   :  { %v627_v13 = vpop.permute.xlu0 %626 }
 0x893   :  { %629 = vst.msk [vmem:[#allocation2] sm:$0xff] %vm316_vm0, %v627_v13  ;;  %631 = vst.msk [vmem:[#allocation5 + $0x10] sm:$0xff] %vm316_vm0, %v627_v13 }
 0x89a   :  { %v634_v14 = vld [vmem:[#allocation2] sm:$0xff] }
 0x89b   :  { %v635_v15 = vpack.c.bf16 %v634_v14, %v634_v14  ;;  %v844_v48 = vld [vmem:[#allocation5 + $0x10] sm:$0xff] }
 0x89c   :  { %v706_v28 = vpop.permute.xlu1 %705 }
 0x89d   :  { %1175 = vmatmul.mubr.msk.bf16.vlgmr.msra.gmra.mxu1 %vm316_vm0, %v635_v15 }
 0x89e   :  { %1182 = vmatprep.mubr.msk.bf16.mxu1 %vm1428_vm1, %v1427_v0  ;;  %1179 = vmatpush3.bf16.msra.mxu1 %v1245_v32 }
 0x89f   :  { %1180 = vmatprep.subr.bf16.mxu1 %v1427_v0 }
 0x8a2   :  { %1181 = vmatpush3.bf16.msra.mxu1 %v1246_v33 }
 0x8a3   :  { %1186 = vmatprep.subr.bf16.mxu1 %v1427_v0 }
 0x95d   :  { %v689_v16 = vpop.f32.mrf.mxu1 }
 0x95e   :  { %v695_v17 = vadd.f32 %v689_v16, %v1544_v52 }
 0x95f   :  { %v1176_v18 = vpop.f32.mrf.mxu1 }
 0x960   :  { %1273 = vtanh.f32 %v695_v17  ;;  %v1066_v22 = vmul.f32 -1.442695, %v695_v17  ;;  %v943_v17 = vld [vmem:[%s1691_s2] sm:$0xff]  ;;  %s1433_s2 = smov [#allocation14]  }
 0x961   :  { %v692_v19 = vpop.f32.mrf.mxu1  ;;  %vm1077_vm2 = vcmp.gt.f32.partialorder %v943_v17, 0.0  ;;  %vm1078_vm3 = vcmp.gt.f32.partialorder %v943_v17, 1.0  ;;  %vm1080_vm4 = vcmp.gt.f32.partialorder %v943_v17, 3.0  ;;  %vm1081_vm5 = vcmp.gt.f32.partialorder %v943_v17, 4.0 }
 0x962   :  { %1275 = vpow2.f32 %v1066_v22  ;;  %v1082_v18 = vsel %vm1077_vm2, 1.0, %v1427_v0  ;;  %v1083_v19 = vsel %vm1078_vm3, 1.0, %v1427_v0  ;;  %v1085_v22 = vsel %vm1080_vm4, 1.0, %v1427_v0 }
 0x963   :  { %v1177_v20 = vpop.f32.mrf.mxu1  ;;  %vm1079_vm6 = vcmp.gt.f32.partialorder %v943_v17, 2.0 }
 0x96d   :  { %v1274_v21 = vpop.eup %1273 }
 0x96e   :  { %710 = vrot.lane.b32.xlu0 %v1274_v21, %s1423_s17  ;;  %v1219_v21 = vpack.i.bf16 %v1083_v19, %v1082_v18 }
 0x96f   :  { %v1276_v23 = vpop.eup %1275 }
 0x970   :  { %v699_v24 = vadd.f32 1.0, %v1276_v23  ;;  %v1086_v23 = vsel %vm1081_vm5, 1.0, %v1427_v0 }
 0x972   :  { %1277 = vrcp.f32 %v699_v24 }
 0x97f   :  { %v1278_v25 = vpop.eup %1277 }
 0x980   :  { %v708_v29 = vmul.f32 %v1278_v25, %v706_v28 }
 0x9e0   :  { %v711_v26 = vpop.permute.xlu0 %710 }
 0x9e1   :  { %v713_v27 = vmul.f32 %v1278_v25, %v711_v26  ;;  %v1084_v26 = vsel %vm1079_vm6, 1.0, %v1427_v0 }
 0x9e3   :  { %715 = vrot.lane.b32.xlu0 %v713_v27, %s1430_s4 }
 0xa55   :  { %v716_v52 = vpop.permute.xlu0 %715 }
 0xa56   :  { %v718_v30 = vadd.f32 %v716_v52, %v708_v29 }
 0xa58   :  { %1279 = vtanh.f32 %v718_v30 }
 0xa65   :  { %v1280_v31 = vpop.eup %1279 }
 0xa66   :  { %721 = vrot.lane.b32.xlu1 %v1280_v31, %s1423_s17 }
 0xa6a   :  { %726 = vrot.lane.b32.xlu1 %v718_v30, %s1431_s12 }
 0xad8   :  { %v722_v34 = vpop.permute.xlu1 %721 }
 0xad9   :  { %v724_v35 = vmul.f32 %v1278_v25, %v722_v34 }
 0xadb   :  { %731 = vrot.lane.b32.xlu0 %v724_v35, %s1430_s4 }
 0xadc   :  { %v727_v36 = vpop.permute.xlu1 %726 }
 0xadd   :  { %729 = vst.msk [vmem:[#allocation3] sm:$0xff] %vm316_vm0, %v727_v36 }
 0xae4   :  { %v808_v37 = vld [vmem:[#allocation3] sm:$0xff] }
 0xae5   :  { %810 = vrot.lane.b32.xlu1 %v808_v37, %s1430_s4 }
 0xb4d   :  { %v732_v38 = vpop.permute.xlu0 %731 }
 0xb4e   :  { %734 = vst.msk [vmem:[#allocation2] sm:$0xff] %vm316_vm0, %v732_v38  ;;  %736 = vst.msk [vmem:[#allocation5 + $0x18] sm:$0xff] %vm316_vm0, %v732_v38 }
 0xb55   :  { %v739_v39 = vld [vmem:[#allocation2] sm:$0xff]  ;;  %v845_v46 = vld [vmem:[#allocation5 + $0x18] sm:$0xff] }
 0xb56   :  { %v740_v41 = vpack.c.bf16 %v739_v39, %v739_v39  ;;  %v848_v49 = vpack.c.bf16 %v845_v46, %v844_v48 }
 0xb57   :  { %v811_v13 = vpop.permute.xlu1 %810 }
 0xb58   :  { %1183 = vmatmul.mubr.msk.bf16.vlgmr.msra.gmra.mxu1 %vm316_vm0, %v740_v41 }
 0xb59   :  { %1187 = vmatpush3.bf16.msra.mxu1 %v1247_v40  ;;  %1190 = vmatprep.mubr.msk.bf16.mxu1 %vm1428_vm1, %v1427_v0 }
 0xb5a   :  { %1188 = vmatprep.subr.bf16.mxu1 %v1427_v0 }
 0xb5d   :  { %1189 = vmatpush3.bf16.msra.mxu1 %v1248_v42 }
 0xb60   :  { %1191 = vmatmul.mubr.msk.bf16.vlgmr.msra.gmra.mxu1 %vm316_vm0, %v847_v45 }
 0xb61   :  { %1194 = vmatprep.mubr.msk.bf16.mxu1 %vm1428_vm1, %v1427_v0 }
 0xb68   :  { %1195 = vmatmul.mubr.msk.bf16.gmra.mxu1 %vm316_vm0, %v848_v49 }
 0xb69   :  { %1198 = vmatprep.mubr.msk.bf16.mxu1 %vm1428_vm1, %v1427_v0 }
 0xc18   :  { %v794_v50 = vpop.f32.mrf.mxu1 }
 0xc19   :  { %v800_v51 = vadd.f32 %v794_v50, %v1546_v57 }
 0xc1a   :  { %v1184_v53 = vpop.f32.mrf.mxu1 }
 0xc1b   :  { %1281 = vtanh.f32 %v800_v51  ;;  %v1070_v6 = vmul.f32 -1.442695, %v800_v51 }
 0xc1c   :  { %v797_v54 = vpop.f32.mrf.mxu1 }
 0xc1d   :  { %1283 = vpow2.f32 %v1070_v6 }
 0xc1e   :  { %v1185_v55 = vpop.f32.mrf.mxu1 }
 0xc20   :  { %v916_v58 = vpop.f32.mrf.mxu1 }
 0xc21   :  { %v1646_v59 = vadd.f32 %v1643_v56, %v916_v58 }
 0xc22   :  { %v1192_v60 = vpop.f32.mrf.mxu1 }
 0xc23   :  { %938 = vst [vmem:[#allocation14] sm:$0xff] %v1646_v59 }
 0xc24   :  { %v919_v61 = vpop.f32.mrf.mxu1 }
 0xc25   :  { %v1650_v62 = vadd.f32 %v1643_v56, %v919_v61 }
 0xc26   :  { %v1193_v57 = vpop.f32.mrf.mxu1 }
 0xc27   :  { %939 = vst [vmem:[#allocation14 + $0x8] sm:$0xff] %v1650_v62 }
 0xc28   :  { %v1282_v63 = vpop.eup %1281  ;;  %v924_v1 = vpop.f32.mrf.mxu1 }
 0xc29   :  { %v1654_v2 = vadd.f32 %v1643_v56, %v924_v1  ;;  %815 = vrot.lane.b32.xlu0 %v1282_v63, %s1423_s17 }
 0xc2a   :  { %v1196_v3 = vpop.f32.mrf.mxu1  ;;  %v1284_v7 = vpop.eup %1283 }
 0xc2b   :  { %940 = vst [vmem:[#allocation14 + $0x10] sm:$0xff] %v1654_v2  ;;  %v804_v8 = vadd.f32 1.0, %v1284_v7 }
 0xc2c   :  { %v927_v4 = vpop.f32.mrf.mxu1 }
 0xc2d   :  { %v1659_v47 = vadd.f32 %v1643_v56, %v927_v4  ;;  %1285 = vrcp.f32 %v804_v8 }
 0xc2e   :  { %v1197_v5 = vpop.f32.mrf.mxu1 }
 0xc2f   :  { %941 = vst [vmem:[#allocation14 + $0x18] sm:$0xff] %v1659_v47 }
 0xc3a   :  { %v1286_v9 = vpop.eup %1285 }
 0xc3b   :  { %v813_v14 = vmul.f32 %v1286_v9, %v811_v13 }
 0xc9b   :  { %v816_v10 = vpop.permute.xlu0 %815 }
 0xc9c   :  { %v818_v11 = vmul.f32 %v1286_v9, %v816_v10 }
 0xc9e   :  { %820 = vrot.lane.b32.xlu0 %v818_v11, %s1430_s4 }
 0xd10   :  { %v821_v15 = vpop.permute.xlu0 %820 }
 0xd11   :  { %v823_v16 = vadd.f32 %v821_v15, %v813_v14 }
 0xd13   :  { %1287 = vtanh.f32 %v823_v16 }
 0xd14   :  { %1289 = vrcp.f32 %v943_v17 }
 0xd20   :  { %v1288_v20 = vpop.eup %1287 }
 0xd21   :  { %826 = vrot.lane.b32.xlu1 %v1288_v20, %s1423_s17  ;;  %v1290_v27 = vpop.eup %1289  ;;  %s1011_s17 = sshll.u32 %s1433_s2, 4  ;;  %s1012_s17 = int_to_ptr.vmem [resolvable:$true] %s1011_s17 }
 0xd22   :  { %s1371_s30 = scalar_lea.vmem %s1012_s17, 640  ;;  %p1376_p7 = scmp.lt.s32.totalorder %s1012_s17, %s1012_s17 }
 0xd23   :  { %p1372_p6 = scmp.ne.s32.totalorder %s1012_s17, %s1371_s30  ;;  %p1377_p8 = scmp.lt.s32.totalorder %s1371_s30, %s1371_s30 }
 0xd25   :  { %1220 = vperm.xlu1 %1218, %v1219_v21   ;;  %p1378_p9 = por %p1377_p8, %p1376_p7 }
 0xd27   :  { %p1379_p10 = pnand %p1378_p9, %p1372_p6 }
 0xd29   :  { %982 = vperm.xlu1 %1218, %v1085_v22  }
 0xd2d   :  { %987 = vperm.xlu1 %1218, %v1086_v23  }
 0xd31   :  { %831 = vrot.lane.b32.xlu1 %v823_v16, %s1431_s12 }
 0xd93   :  { %v827_v24 = vpop.permute.xlu1 %826 }
 0xd94   :  { %v829_v25 = vmul.f32 %v1286_v9, %v827_v24 }
 0xd96   :  { %836 = vrot.lane.b32.xlu0 %v829_v25, %s1430_s4 }
 0xd9a   :  { %977 = vperm.xlu0 %1224, %v1084_v26  }
 0xd9e   :  { %1001 = vperm.xlu0 %1224, %v1290_v27  }
 0xda0   :  { %v1221_v28 = vpop.permute.xlu1 %1220 }
 0xda1   :  { %v1223_v32 = vunpack.i.h.bf16 %v1221_v28  ;;  %v1222_v33 = vunpack.i.l.bf16 %v1221_v28 }
 0xda3   :  { %v991_v0 = vmul.f32 %v1223_v32, %v1650_v62  ;;  %v990_v36 = vmul.f32 %v1222_v33, %v1646_v59 }
 0xda4   :  { %v983_v29 = vpop.permute.xlu1 %982 }
 0xda5   :  { %v995_v39 = vadd.f32 %v991_v0, %v990_v36  ;;  %v993_v40 = vmul.f32 %v983_v29, %v1659_v47 }
 0xda8   :  { %v988_v52 = vpop.permute.xlu1 %987 }
 0xdac   :  { %v832_v30 = vpop.permute.xlu1 %831 }
 0xdad   :  { %834 = vst.msk [vmem:[#allocation3] sm:$0xff] %vm316_vm0, %v832_v30 }
 0xe08   :  { %v837_v31 = vpop.permute.xlu0 %836 }
 0xe09   :  { %839 = vst.msk [vmem:[#allocation2] sm:$0xff] %vm316_vm0, %v837_v31  ;;  %841 = vst.msk [vmem:[#allocation5 + $0x20] sm:$0xff] %vm316_vm0, %v837_v31 }
 0xe10   :  { %v846_v34 = vld [vmem:[#allocation5 + $0x20] sm:$0xff] }
 0xe11   :  { %v849_v35 = vpack.c.bf16 %v846_v34, %v846_v34 }
 0xe13   :  { %1199 = vmatmul.mubr.msk.bf16.gmra.mxu1 %vm316_vm0, %v849_v35 }
 0xe15   :  { %v978_v37 = vpop.permute.xlu0 %977 }
 0xe16   :  { %v992_v38 = vmul.f32 %v978_v37, %v1654_v2 }
 0xe18   :  { %v996_v41 = vadd.f32 %v995_v39, %v992_v38 }
 0xe1a   :  { %v997_v42 = vadd.f32 %v996_v41, %v993_v40 }
 0xed3   :  { %v932_v43 = vpop.f32.mrf.mxu1 }
 0xed4   :  { %v933_v44 = vadd.f32 %v1643_v56, %v932_v43 }
 0xed5   :  { %v1200_v45 = vpop.f32.mrf.mxu1 }
 0xed6   :  { %942 = vst [vmem:[#allocation14 + $0x20] sm:$0xff] %v933_v44  ;;  %v994_v46 = vmul.f32 %v988_v52, %v933_v44 }
 0xed7   :  { %v935_v48 = vpop.f32.mrf.mxu1 }
 0xed8   :  { %1382 = shalt.err (!%p1379_p10)
}
 0xed9   :  { %s1435_s10 = smov 128   ;;  %s1436_s11 = smov 8   ;;  %v998_v49 = vadd.f32 %v997_v42, %v994_v46  ;;  %v1002_v50 = vpop.permute.xlu0 %1001  ;;  %v1201_v51 = vpop.f32.mrf.mxu1 }
 0xeda   :  { %1017 = dma.vmem_to_hbm [thread:$0]  %s1012_s17, 640, %s1697_s8, [#allocation8], %s1435_s10, %s1435_s10, %s1436_s11  }
 0xedb   :  { %v1004_v53 = vmul.f32 %v1002_v50, %v998_v49  ;;  %s1391_s13 = scalar_lea.vmem %s1025_s29, 128  ;;  %p1396_p12 = scmp.lt.s32.totalorder %s1025_s29, %s1025_s29 }
 0xedc   :  { %p1392_p11 = scmp.ne.s32.totalorder %s1025_s29, %s1391_s13  ;;  %p1397_p13 = scmp.lt.s32.totalorder %s1391_s13, %s1391_s13 }
 0xedd   :  { %1005 = vst [vmem:[#allocation15] sm:$0xff] %v1004_v53 }
 0xede   :  { %p1398_p0 = por %p1397_p13, %p1396_p12 }
 0xee0   :  { %p1399_p1 = pnand %p1398_p0, %p1392_p11 }
 0xee2   :  { %1402 = shalt.err (!%p1399_p1)
}
 0xee3   :  { %1027 = dma.vmem_to_hbm [thread:$0]  %s1025_s29, 128, %s1698_s9, [#allocation16]  }
 0xee4   :  { %1417 = dma.done.wait [#allocation8], 640  }
 0xee5   :  { %1418 = vsyncadd [#allocation8], 4294966656 }
 0xee6   :  { %1419 = dma.done.wait [#allocation16], 128  }
 0xee7   :  { %1420 = vsyncadd [#allocation16], 4294967168 }
 0xee8   :  { %1034 = vsyncpa [#allocation7], 1 }
 0xee9   :  { %1035 = vsyncpa [#allocation10], 1 }
 0xeea   :  { %1036 = vsyncpa [#allocation13], 1 }
 0xeeb   :  { %1037 = vsyncpa [#allocation8], 1 }
 0xeec   :  { %1038 = vsyncpa [#allocation16], 1 }

</bundles_post_ra>
